<compile_context>
chip_gen: v7x
topology: tpu7x:2x2x1
jax: 0.10.0
libtpu: 0.0.40
codegen_flags: <defaults>
</compile_context>

<pallas_src>
import math

import jax
import jax.numpy as jnp
from jax.experimental import pallas as pl
from jax.experimental.pallas import tpu as pltpu


# ----------------------------------------------------------------------------
# Kernel helpers
# ----------------------------------------------------------------------------

def _lstm_cell_update(gates, c_prev, hidden):
    """Apply LSTM nonlinearities.  PyTorch gate order: i, f, g, o.

    gates : (rows, 4*hidden) float32 pre-activations
    c_prev: (rows, hidden)   float32 previous cell state
    """
    i_g = jax.nn.sigmoid(gates[:, 0 * hidden:1 * hidden])
    f_g = jax.nn.sigmoid(gates[:, 1 * hidden:2 * hidden])
    g_g = jnp.tanh(gates[:, 2 * hidden:3 * hidden])
    o_g = jax.nn.sigmoid(gates[:, 3 * hidden:4 * hidden])
    c_new = f_g * c_prev + i_g * g_g
    h_new = o_g * jnp.tanh(c_new)
    return h_new, c_new


def _build_fused_kernel(T, B, hidden12, hidden3):
    """Build the fused forward kernel.

    hidden12: hidden sizes of the fused lstm_1 + lstm_2 layer stack (run over
              the real time axis, batch B).
    hidden3 : hidden sizes of the lstm_3 stack (run over a length-B "time"
              axis with batch 1 -- the only column consumed downstream).
    """
    L12 = len(hidden12)
    L3 = len(hidden3)

    def kernel(*refs):
        # --- unpack positional refs -------------------------------------
        x_ref = refs[0]                      # (T*B, I), row = t*B + b
        pos = 1
        w12 = []
        for _ in range(L12):
            w12.append((refs[pos], refs[pos + 1], refs[pos + 2]))
            pos += 3
        w3 = []
        for _ in range(L3):
            w3.append((refs[pos], refs[pos + 1], refs[pos + 2]))
            pos += 3
        wfc_ref, bfc_ref, out_ref = refs[pos], refs[pos + 1], refs[pos + 2]

        # --- Phase 1: hoisted layer-1 input projection --------------------
        # One batched matmul over all T timesteps (off the serial chain).
        wx0, wh0, b0 = w12[0]
        gx0 = (jnp.dot(x_ref[...], wx0[...],
                       preferred_element_type=jnp.float32)
               + b0[...])                                   # (T*B, 4*H[0])

        wh0_v = wh0[...]
        rest = [(wx[...], wh[...], b[...]) for (wx, wh, b) in w12[1:]]

        h = [jnp.zeros((B, hsz), jnp.float32) for hsz in hidden12]
        c = [jnp.zeros((B, hsz), jnp.float32) for hsz in hidden12]

        # --- Phase 2: serial time recurrence, fully unrolled ---------------
        for t in range(T):
            g = gx0[t * B:(t + 1) * B, :] + jnp.dot(
                h[0], wh0_v, preferred_element_type=jnp.float32)
            h[0], c[0] = _lstm_cell_update(g, c[0], hidden12[0])
            below = h[0]
            for l in range(1, L12):
                wx_v, wh_v, b_v = rest[l - 1]
                g = (jnp.dot(below, wx_v, preferred_element_type=jnp.float32)
                     + jnp.dot(h[l], wh_v, preferred_element_type=jnp.float32)
                     + b_v)
                h[l], c[l] = _lstm_cell_update(g, c[l], hidden12[l])
                below = h[l]

        # lstm_2's final hidden state == out2[:, T-1, :], the only column of
        # out2 that the rest of the network can observe.
        h2_final = h[L12 - 1]                               # (B, hidden12[-1])

        # --- Phase 3: lstm_3 (length-B sequence, batch 1) + fused Linear ---
        w3_v = [(wx[...], wh[...], b[...]) for (wx, wh, b) in w3]
        wfc_v = wfc_ref[...]
        bfc_v = bfc_ref[...]

        h3 = [jnp.zeros((1, hsz), jnp.float32) for hsz in hidden3]
        c3 = [jnp.zeros((1, hsz), jnp.float32) for hsz in hidden3]

        for s in range(B):
            below = h2_final[s:s + 1, :]                    # (1, hidden12[-1])
            for l in range(L3):
                wx_v, wh_v, b_v = w3_v[l]
                g = (jnp.dot(below, wx_v, preferred_element_type=jnp.float32)
                     + jnp.dot(h3[l], wh_v, preferred_element_type=jnp.float32)
                     + b_v)
                h3[l], c3[l] = _lstm_cell_update(g, c3[l], hidden3[l])
                below = h3[l]
            row = (jnp.dot(below, wfc_v, preferred_element_type=jnp.float32)
                   + bfc_v)                                 # (1, out_dim)
            out_ref[s:s + 1, :] = row.astype(out_ref.dtype)

    return kernel


# ----------------------------------------------------------------------------
# Parameter preparation (done ONCE, not per forward call)
# ----------------------------------------------------------------------------

def prepare_lstm_params(layer_params):
    """PyTorch (w_ih, w_hh, b_ih, b_hh) -> (W_ih^T, W_hh^T, b_ih + b_hh)."""
    prepared = []
    for (w_ih, w_hh, b_ih, b_hh) in layer_params:
        four_h = w_ih.shape[0]
        prepared.append((
            jnp.asarray(w_ih, jnp.float32).T,               # (in, 4H)
            jnp.asarray(w_hh, jnp.float32).T,               # (H, 4H)
            (jnp.asarray(b_ih, jnp.float32)
             + jnp.asarray(b_hh, jnp.float32)).reshape(1, four_h),
        ))
    return prepared


def prepare_fc_params(w, b):
    out_dim = w.shape[0]
    return (jnp.asarray(w, jnp.float32).T,                  # (H, O)
            jnp.asarray(b, jnp.float32).reshape(1, out_dim))


# ----------------------------------------------------------------------------
# Fused forward (mirrors LSTM.forward of the PyTorch reference)
# ----------------------------------------------------------------------------

def lstm_module_forward(x, p1, p2, p3, fc):
    """x: (B, T, input_dim) batch-first.  p1/p2/p3: prepared per-layer params
    of lstm_1/lstm_2/lstm_3.  fc: (W_fc^T, b_fc)."""
    B, T, I = x.shape
    stack12 = p1 + p2                       # lstm_1 + lstm_2 share the time loop
    hidden12 = [wh.shape[0] for (_, wh, _) in stack12]
    hidden3 = [wh.shape[0] for (_, wh, _) in p3]
    wfc_t, bfc = fc
    out_dim = wfc_t.shape[1]

    # Time-major flattening outside the kernel (tiny array): row = t*B + b.
    x_tm = jnp.transpose(x, (1, 0, 2)).reshape(T * B, I).astype(jnp.float32)

    inputs = [x_tm]
    for (wx, wh, b) in stack12 + p3:
        inputs.extend([wx, wh, b])
    inputs.extend([wfc_t, bfc])

    kernel = _build_fused_kernel(T, B, hidden12, hidden3)

    # All operands are 2-D, whole-array blocks resident in VMEM; no grid.
    in_specs = [pl.BlockSpec(a.shape, lambda: (0, 0)) for a in inputs]

    return pl.pallas_call(
        kernel,
        out_shape=jax.ShapeDtypeStruct((B, out_dim), jnp.float32),
        in_specs=in_specs,
        out_specs=pl.BlockSpec((B, out_dim), lambda: (0, 0)),
        compiler_params=pltpu.CompilerParams(
            vmem_limit_bytes=8 * 1024 * 1024),   # footprint <<1 MiB; keep small
    )(*inputs)


# ----------------------------------------------------------------------------
# Pure-JAX reference of the FULL (unreduced) module, for correctness check
# ----------------------------------------------------------------------------

def _ref_lstm_layer(x_tbi, wx, wh, b):
    T, B, _ = x_tbi.shape
    H = wh.shape[0]
    h = jnp.zeros((B, H), jnp.float32)
    c = jnp.zeros((B, H), jnp.float32)
    outs = []
    for t in range(T):
        g = x_tbi[t] @ wx + h @ wh + b
        h, c = _lstm_cell_update(g, c, H)
        outs.append(h)
    return jnp.stack(outs, axis=0)


def _ref_forward(x, p1, p2, p3, fc):
    def run_stack(x_tbi, layers):
        hcur = x_tbi
        for (wx, wh, b) in layers:
            hcur = _ref_lstm_layer(hcur, wx, wh, b)
        return hcur

    out1 = jnp.transpose(run_stack(jnp.transpose(x, (1, 0, 2)), p1), (1, 0, 2))
    out2 = jnp.transpose(run_stack(jnp.transpose(out1, (1, 0, 2)), p2), (1, 0, 2))
    out3 = run_stack(out2, p3)      # lstm_3 quirk: axis 0 (=B) treated as time
    last = out3[:, -1, :]
    wfc_t, bfc = fc
    return last @ wfc_t + bfc


# ----------------------------------------------------------------------------
# Deterministic PyTorch-style init
# ----------------------------------------------------------------------------

def init_lstm_params(key, input_size, hidden_size, n_layers):
    params = []
    bound = 1.0 / math.sqrt(hidden_size)
    for layer in range(n_layers):
        in_size = input_size if layer == 0 else hidden_size
        key, k1, k2, k3, k4 = jax.random.split(key, 5)
        w_ih = jax.random.uniform(k1, (4 * hidden_size, in_size),
                                  jnp.float32, -bound, bound)
        w_hh = jax.random.uniform(k2, (4 * hidden_size, hidden_size),
                                  jnp.float32, -bound, bound)
        b_ih = jax.random.uniform(k3, (4 * hidden_size,),
                                  jnp.float32, -bound, bound)
        b_hh = jax.random.uniform(k4, (4 * hidden_size,),
                                  jnp.float32, -bound, bound)
        params.append((w_ih, w_hh, b_ih, b_hh))
    return params, key


def init_linear_params(key, in_features, out_features):
    bound = 1.0 / math.sqrt(in_features)
    key, k1, k2 = jax.random.split(key, 3)
    w = jax.random.uniform(k1, (out_features, in_features),
                           jnp.float32, -bound, bound)
    b = jax.random.uniform(k2, (out_features,), jnp.float32, -bound, bound)
    return (w, b), key


# ----------------------------------------------------------------------------
# Main
# ----------------------------------------------------------------------------

if __name__ == "__main__":
    batch = 2
    seq = 8
    input_dim = 4
    hidden_dim = (32, 24, 16)
    output_size = 1
    n_layers = 1

    key = jax.random.PRNGKey(0)
    key, xkey = jax.random.split(key)
    x = jax.random.normal(xkey, (batch, seq, input_dim), jnp.float32)

    p1_raw, key = init_lstm_params(key, input_dim, hidden_dim[0], n_layers)
    p2_raw, key = init_lstm_params(key, hidden_dim[0], hidden_dim[1], n_layers)
    p3_raw, key = init_lstm_params(key, hidden_dim[1], hidden_dim[2], n_layers)
    (fc_w, fc_b), key = init_linear_params(key, hidden_dim[2], output_size)

    p1 = prepare_lstm_params(p1_raw)
    p2 = prepare_lstm_params(p2_raw)
    p3 = prepare_lstm_params(p3_raw)
    fc = prepare_fc_params(fc_w, fc_b)

    out = lstm_module_forward(x, p1, p2, p3, fc)
    out = jax.block_until_ready(out)
    assert out.shape == (batch, output_size), out.shape

    ref = jax.block_until_ready(_ref_forward(x, p1, p2, p3, fc))
    max_err = float(jnp.max(jnp.abs(out - ref)))
    assert max_err < 1e-3, f"kernel/reference mismatch: max_err={max_err}"

    print("KERNEL_OK")
</pallas_src>

<mosaic_0001>
module attributes {stable_mosaic.version = 11 : i64} {
  func.func @kernel(%arg0: memref<16x4xf32, #tpu.memory_space<vmem>>, %arg1: memref<4x128xf32, #tpu.memory_space<vmem>>, %arg2: memref<32x128xf32, #tpu.memory_space<vmem>>, %arg3: memref<1x128xf32, #tpu.memory_space<vmem>>, %arg4: memref<32x96xf32, #tpu.memory_space<vmem>>, %arg5: memref<24x96xf32, #tpu.memory_space<vmem>>, %arg6: memref<1x96xf32, #tpu.memory_space<vmem>>, %arg7: memref<24x64xf32, #tpu.memory_space<vmem>>, %arg8: memref<16x64xf32, #tpu.memory_space<vmem>>, %arg9: memref<1x64xf32, #tpu.memory_space<vmem>>, %arg10: memref<16x1xf32, #tpu.memory_space<vmem>>, %arg11: memref<1x1xf32, #tpu.memory_space<vmem>>, %arg12: memref<2x1xf32, #tpu.memory_space<vmem>>) attributes {dimension_semantics = [], scalar_prefetch = 0 : i64, scratch_operands = 0 : i64, tpu.core_type = #tpu.core_type<tc>} {
    %c0 = arith.constant 0 : index
    %c0_0 = arith.constant 0 : index
    %0 = vector.load %arg0[%c0, %c0_0] : memref<16x4xf32, #tpu.memory_space<vmem>>, vector<16x4xf32>
    %c0_1 = arith.constant 0 : index
    %c0_2 = arith.constant 0 : index
    %1 = vector.load %arg1[%c0_1, %c0_2] : memref<4x128xf32, #tpu.memory_space<vmem>>, vector<4x128xf32>
    %cst = arith.constant dense<0.000000e+00> : vector<16x128xf32>
    %2 = tpu.matmul %0, %1, %cst {dimension_numbers = #tpu.dot_dimension_numbers<[1], [0], [0], [1], [0, 0, 1, 1], [], []>} : vector<16x4xf32>, vector<4x128xf32>, vector<16x128xf32> -> vector<16x128xf32>
    %c0_3 = arith.constant 0 : index
    %c0_4 = arith.constant 0 : index
    %3 = vector.load %arg3[%c0_3, %c0_4] : memref<1x128xf32, #tpu.memory_space<vmem>>, vector<1x128xf32>
    %4 = vector.broadcast %3 : vector<1x128xf32> to vector<16x128xf32>
    %5 = arith.addf %2, %4 : vector<16x128xf32>
    %c0_5 = arith.constant 0 : index
    %c0_6 = arith.constant 0 : index
    %6 = vector.load %arg2[%c0_5, %c0_6] : memref<32x128xf32, #tpu.memory_space<vmem>>, vector<32x128xf32>
    %c0_7 = arith.constant 0 : index
    %c0_8 = arith.constant 0 : index
    %7 = vector.load %arg4[%c0_7, %c0_8] : memref<32x96xf32, #tpu.memory_space<vmem>>, vector<32x96xf32>
    %c0_9 = arith.constant 0 : index
    %c0_10 = arith.constant 0 : index
    %8 = vector.load %arg5[%c0_9, %c0_10] : memref<24x96xf32, #tpu.memory_space<vmem>>, vector<24x96xf32>
    %c0_11 = arith.constant 0 : index
    %c0_12 = arith.constant 0 : index
    %9 = vector.load %arg6[%c0_11, %c0_12] : memref<1x96xf32, #tpu.memory_space<vmem>>, vector<1x96xf32>
    %cst_13 = arith.constant 0.000000e+00 : f32
    %10 = vector.broadcast %cst_13 : f32 to vector<2x32xf32>
    %cst_14 = arith.constant 0.000000e+00 : f32
    %11 = vector.broadcast %cst_14 : f32 to vector<2x24xf32>
    %cst_15 = arith.constant 0.000000e+00 : f32
    %12 = vector.broadcast %cst_15 : f32 to vector<2x32xf32>
    %cst_16 = arith.constant 0.000000e+00 : f32
    %13 = vector.broadcast %cst_16 : f32 to vector<2x24xf32>
    %14 = vector.extract_strided_slice %5 {offsets = [0, 0], sizes = [2, 128], strides = [1, 1]} : vector<16x128xf32> to vector<2x128xf32>
    %cst_17 = arith.constant dense<0.000000e+00> : vector<2x128xf32>
    %15 = tpu.matmul %10, %6, %cst_17 {dimension_numbers = #tpu.dot_dimension_numbers<[1], [0], [0], [1], [0, 0, 1, 1], [], []>} : vector<2x32xf32>, vector<32x128xf32>, vector<2x128xf32> -> vector<2x128xf32>
    %16 = arith.addf %14, %15 : vector<2x128xf32>
    %17 = vector.extract_strided_slice %16 {offsets = [0, 0], sizes = [2, 32], strides = [1, 1]} : vector<2x128xf32> to vector<2x32xf32>
    %18 = arith.negf %17 : vector<2x32xf32>
    %19 = math.exp %18 : vector<2x32xf32>
    %cst_18 = arith.constant 1.000000e+00 : f32
    %20 = vector.broadcast %cst_18 : f32 to vector<2x32xf32>
    %21 = arith.addf %20, %19 : vector<2x32xf32>
    %22 = arith.divf %20, %21 : vector<2x32xf32>
    %23 = vector.extract_strided_slice %16 {offsets = [0, 32], sizes = [2, 32], strides = [1, 1]} : vector<2x128xf32> to vector<2x32xf32>
    %24 = arith.negf %23 : vector<2x32xf32>
    %25 = math.exp %24 : vector<2x32xf32>
    %cst_19 = arith.constant 1.000000e+00 : f32
    %26 = vector.broadcast %cst_19 : f32 to vector<2x32xf32>
    %27 = arith.addf %26, %25 : vector<2x32xf32>
    %28 = arith.divf %26, %27 : vector<2x32xf32>
    %29 = vector.extract_strided_slice %16 {offsets = [0, 64], sizes = [2, 32], strides = [1, 1]} : vector<2x128xf32> to vector<2x32xf32>
    %30 = math.tanh %29 : vector<2x32xf32>
    %31 = vector.extract_strided_slice %16 {offsets = [0, 96], sizes = [2, 32], strides = [1, 1]} : vector<2x128xf32> to vector<2x32xf32>
    %32 = arith.negf %31 : vector<2x32xf32>
    %33 = math.exp %32 : vector<2x32xf32>
    %cst_20 = arith.constant 1.000000e+00 : f32
    %34 = vector.broadcast %cst_20 : f32 to vector<2x32xf32>
    %35 = arith.addf %34, %33 : vector<2x32xf32>
    %36 = arith.divf %34, %35 : vector<2x32xf32>
    %37 = arith.mulf %28, %12 : vector<2x32xf32>
    %38 = arith.mulf %22, %30 : vector<2x32xf32>
    %39 = arith.addf %37, %38 : vector<2x32xf32>
    %40 = math.tanh %39 : vector<2x32xf32>
    %41 = arith.mulf %36, %40 : vector<2x32xf32>
    %cst_21 = arith.constant dense<0.000000e+00> : vector<2x96xf32>
    %42 = tpu.matmul %41, %7, %cst_21 {dimension_numbers = #tpu.dot_dimension_numbers<[1], [0], [0], [1], [0, 0, 1, 1], [], []>} : vector<2x32xf32>, vector<32x96xf32>, vector<2x96xf32> -> vector<2x96xf32>
    %cst_22 = arith.constant dense<0.000000e+00> : vector<2x96xf32>
    %43 = tpu.matmul %11, %8, %cst_22 {dimension_numbers = #tpu.dot_dimension_numbers<[1], [0], [0], [1], [0, 0, 1, 1], [], []>} : vector<2x24xf32>, vector<24x96xf32>, vector<2x96xf32> -> vector<2x96xf32>
    %44 = arith.addf %42, %43 : vector<2x96xf32>
    %45 = vector.broadcast %9 : vector<1x96xf32> to vector<2x96xf32>
    %46 = arith.addf %44, %45 : vector<2x96xf32>
    %47 = vector.extract_strided_slice %46 {offsets = [0, 0], sizes = [2, 24], strides = [1, 1]} : vector<2x96xf32> to vector<2x24xf32>
    %48 = arith.negf %47 : vector<2x24xf32>
    %49 = math.exp %48 : vector<2x24xf32>
    %cst_23 = arith.constant 1.000000e+00 : f32
    %50 = vector.broadcast %cst_23 : f32 to vector<2x24xf32>
    %51 = arith.addf %50, %49 : vector<2x24xf32>
    %52 = arith.divf %50, %51 : vector<2x24xf32>
    %53 = vector.extract_strided_slice %46 {offsets = [0, 24], sizes = [2, 24], strides = [1, 1]} : vector<2x96xf32> to vector<2x24xf32>
    %54 = arith.negf %53 : vector<2x24xf32>
    %55 = math.exp %54 : vector<2x24xf32>
    %cst_24 = arith.constant 1.000000e+00 : f32
    %56 = vector.broadcast %cst_24 : f32 to vector<2x24xf32>
    %57 = arith.addf %56, %55 : vector<2x24xf32>
    %58 = arith.divf %56, %57 : vector<2x24xf32>
    %59 = vector.extract_strided_slice %46 {offsets = [0, 48], sizes = [2, 24], strides = [1, 1]} : vector<2x96xf32> to vector<2x24xf32>
    %60 = math.tanh %59 : vector<2x24xf32>
    %61 = vector.extract_strided_slice %46 {offsets = [0, 72], sizes = [2, 24], strides = [1, 1]} : vector<2x96xf32> to vector<2x24xf32>
    %62 = arith.negf %61 : vector<2x24xf32>
    %63 = math.exp %62 : vector<2x24xf32>
    %cst_25 = arith.constant 1.000000e+00 : f32
    %64 = vector.broadcast %cst_25 : f32 to vector<2x24xf32>
    %65 = arith.addf %64, %63 : vector<2x24xf32>
    %66 = arith.divf %64, %65 : vector<2x24xf32>
    %67 = arith.mulf %58, %13 : vector<2x24xf32>
    %68 = arith.mulf %52, %60 : vector<2x24xf32>
    %69 = arith.addf %67, %68 : vector<2x24xf32>
    %70 = math.tanh %69 : vector<2x24xf32>
    %71 = arith.mulf %66, %70 : vector<2x24xf32>
    %72 = vector.extract_strided_slice %5 {offsets = [2, 0], sizes = [2, 128], strides = [1, 1]} : vector<16x128xf32> to vector<2x128xf32>
    %cst_26 = arith.constant dense<0.000000e+00> : vector<2x128xf32>
    %73 = tpu.matmul %41, %6, %cst_26 {dimension_numbers = #tpu.dot_dimension_numbers<[1], [0], [0], [1], [0, 0, 1, 1], [], []>} : vector<2x32xf32>, vector<32x128xf32>, vector<2x128xf32> -> vector<2x128xf32>
    %74 = arith.addf %72, %73 : vector<2x128xf32>
    %75 = vector.extract_strided_slice %74 {offsets = [0, 0], sizes = [2, 32], strides = [1, 1]} : vector<2x128xf32> to vector<2x32xf32>
    %76 = arith.negf %75 : vector<2x32xf32>
    %77 = math.exp %76 : vector<2x32xf32>
    %cst_27 = arith.constant 1.000000e+00 : f32
    %78 = vector.broadcast %cst_27 : f32 to vector<2x32xf32>
    %79 = arith.addf %78, %77 : vector<2x32xf32>
    %80 = arith.divf %78, %79 : vector<2x32xf32>
    %81 = vector.extract_strided_slice %74 {offsets = [0, 32], sizes = [2, 32], strides = [1, 1]} : vector<2x128xf32> to vector<2x32xf32>
    %82 = arith.negf %81 : vector<2x32xf32>
    %83 = math.exp %82 : vector<2x32xf32>
    %cst_28 = arith.constant 1.000000e+00 : f32
    %84 = vector.broadcast %cst_28 : f32 to vector<2x32xf32>
    %85 = arith.addf %84, %83 : vector<2x32xf32>
    %86 = arith.divf %84, %85 : vector<2x32xf32>
    %87 = vector.extract_strided_slice %74 {offsets = [0, 64], sizes = [2, 32], strides = [1, 1]} : vector<2x128xf32> to vector<2x32xf32>
    %88 = math.tanh %87 : vector<2x32xf32>
    %89 = vector.extract_strided_slice %74 {offsets = [0, 96], sizes = [2, 32], strides = [1, 1]} : vector<2x128xf32> to vector<2x32xf32>
    %90 = arith.negf %89 : vector<2x32xf32>
    %91 = math.exp %90 : vector<2x32xf32>
    %cst_29 = arith.constant 1.000000e+00 : f32
    %92 = vector.broadcast %cst_29 : f32 to vector<2x32xf32>
    %93 = arith.addf %92, %91 : vector<2x32xf32>
    %94 = arith.divf %92, %93 : vector<2x32xf32>
    %95 = arith.mulf %86, %39 : vector<2x32xf32>
    %96 = arith.mulf %80, %88 : vector<2x32xf32>
    %97 = arith.addf %95, %96 : vector<2x32xf32>
    %98 = math.tanh %97 : vector<2x32xf32>
    %99 = arith.mulf %94, %98 : vector<2x32xf32>
    %cst_30 = arith.constant dense<0.000000e+00> : vector<2x96xf32>
    %100 = tpu.matmul %99, %7, %cst_30 {dimension_numbers = #tpu.dot_dimension_numbers<[1], [0], [0], [1], [0, 0, 1, 1], [], []>} : vector<2x32xf32>, vector<32x96xf32>, vector<2x96xf32> -> vector<2x96xf32>
    %cst_31 = arith.constant dense<0.000000e+00> : vector<2x96xf32>
    %101 = tpu.matmul %71, %8, %cst_31 {dimension_numbers = #tpu.dot_dimension_numbers<[1], [0], [0], [1], [0, 0, 1, 1], [], []>} : vector<2x24xf32>, vector<24x96xf32>, vector<2x96xf32> -> vector<2x96xf32>
    %102 = arith.addf %100, %101 : vector<2x96xf32>
    %103 = vector.broadcast %9 : vector<1x96xf32> to vector<2x96xf32>
    %104 = arith.addf %102, %103 : vector<2x96xf32>
    %105 = vector.extract_strided_slice %104 {offsets = [0, 0], sizes = [2, 24], strides = [1, 1]} : vector<2x96xf32> to vector<2x24xf32>
    %106 = arith.negf %105 : vector<2x24xf32>
    %107 = math.exp %106 : vector<2x24xf32>
    %cst_32 = arith.constant 1.000000e+00 : f32
    %108 = vector.broadcast %cst_32 : f32 to vector<2x24xf32>
    %109 = arith.addf %108, %107 : vector<2x24xf32>
    %110 = arith.divf %108, %109 : vector<2x24xf32>
    %111 = vector.extract_strided_slice %104 {offsets = [0, 24], sizes = [2, 24], strides = [1, 1]} : vector<2x96xf32> to vector<2x24xf32>
    %112 = arith.negf %111 : vector<2x24xf32>
    %113 = math.exp %112 : vector<2x24xf32>
    %cst_33 = arith.constant 1.000000e+00 : f32
    %114 = vector.broadcast %cst_33 : f32 to vector<2x24xf32>
    %115 = arith.addf %114, %113 : vector<2x24xf32>
    %116 = arith.divf %114, %115 : vector<2x24xf32>
    %117 = vector.extract_strided_slice %104 {offsets = [0, 48], sizes = [2, 24], strides = [1, 1]} : vector<2x96xf32> to vector<2x24xf32>
    %118 = math.tanh %117 : vector<2x24xf32>
    %119 = vector.extract_strided_slice %104 {offsets = [0, 72], sizes = [2, 24], strides = [1, 1]} : vector<2x96xf32> to vector<2x24xf32>
    %120 = arith.negf %119 : vector<2x24xf32>
    %121 = math.exp %120 : vector<2x24xf32>
    %cst_34 = arith.constant 1.000000e+00 : f32
    %122 = vector.broadcast %cst_34 : f32 to vector<2x24xf32>
    %123 = arith.addf %122, %121 : vector<2x24xf32>
    %124 = arith.divf %122, %123 : vector<2x24xf32>
    %125 = arith.mulf %116, %69 : vector<2x24xf32>
    %126 = arith.mulf %110, %118 : vector<2x24xf32>
    %127 = arith.addf %125, %126 : vector<2x24xf32>
    %128 = math.tanh %127 : vector<2x24xf32>
    %129 = arith.mulf %124, %128 : vector<2x24xf32>
    %130 = vector.extract_strided_slice %5 {offsets = [4, 0], sizes = [2, 128], strides = [1, 1]} : vector<16x128xf32> to vector<2x128xf32>
    %cst_35 = arith.constant dense<0.000000e+00> : vector<2x128xf32>
    %131 = tpu.matmul %99, %6, %cst_35 {dimension_numbers = #tpu.dot_dimension_numbers<[1], [0], [0], [1], [0, 0, 1, 1], [], []>} : vector<2x32xf32>, vector<32x128xf32>, vector<2x128xf32> -> vector<2x128xf32>
    %132 = arith.addf %130, %131 : vector<2x128xf32>
    %133 = vector.extract_strided_slice %132 {offsets = [0, 0], sizes = [2, 32], strides = [1, 1]} : vector<2x128xf32> to vector<2x32xf32>
    %134 = arith.negf %133 : vector<2x32xf32>
    %135 = math.exp %134 : vector<2x32xf32>
    %cst_36 = arith.constant 1.000000e+00 : f32
    %136 = vector.broadcast %cst_36 : f32 to vector<2x32xf32>
    %137 = arith.addf %136, %135 : vector<2x32xf32>
    %138 = arith.divf %136, %137 : vector<2x32xf32>
    %139 = vector.extract_strided_slice %132 {offsets = [0, 32], sizes = [2, 32], strides = [1, 1]} : vector<2x128xf32> to vector<2x32xf32>
    %140 = arith.negf %139 : vector<2x32xf32>
    %141 = math.exp %140 : vector<2x32xf32>
    %cst_37 = arith.constant 1.000000e+00 : f32
    %142 = vector.broadcast %cst_37 : f32 to vector<2x32xf32>
    %143 = arith.addf %142, %141 : vector<2x32xf32>
    %144 = arith.divf %142, %143 : vector<2x32xf32>
    %145 = vector.extract_strided_slice %132 {offsets = [0, 64], sizes = [2, 32], strides = [1, 1]} : vector<2x128xf32> to vector<2x32xf32>
    %146 = math.tanh %145 : vector<2x32xf32>
    %147 = vector.extract_strided_slice %132 {offsets = [0, 96], sizes = [2, 32], strides = [1, 1]} : vector<2x128xf32> to vector<2x32xf32>
    %148 = arith.negf %147 : vector<2x32xf32>
    %149 = math.exp %148 : vector<2x32xf32>
    %cst_38 = arith.constant 1.000000e+00 : f32
    %150 = vector.broadcast %cst_38 : f32 to vector<2x32xf32>
    %151 = arith.addf %150, %149 : vector<2x32xf32>
    %152 = arith.divf %150, %151 : vector<2x32xf32>
    %153 = arith.mulf %144, %97 : vector<2x32xf32>
    %154 = arith.mulf %138, %146 : vector<2x32xf32>
    %155 = arith.addf %153, %154 : vector<2x32xf32>
    %156 = math.tanh %155 : vector<2x32xf32>
    %157 = arith.mulf %152, %156 : vector<2x32xf32>
    %cst_39 = arith.constant dense<0.000000e+00> : vector<2x96xf32>
    %158 = tpu.matmul %157, %7, %cst_39 {dimension_numbers = #tpu.dot_dimension_numbers<[1], [0], [0], [1], [0, 0, 1, 1], [], []>} : vector<2x32xf32>, vector<32x96xf32>, vector<2x96xf32> -> vector<2x96xf32>
    %cst_40 = arith.constant dense<0.000000e+00> : vector<2x96xf32>
    %159 = tpu.matmul %129, %8, %cst_40 {dimension_numbers = #tpu.dot_dimension_numbers<[1], [0], [0], [1], [0, 0, 1, 1], [], []>} : vector<2x24xf32>, vector<24x96xf32>, vector<2x96xf32> -> vector<2x96xf32>
    %160 = arith.addf %158, %159 : vector<2x96xf32>
    %161 = vector.broadcast %9 : vector<1x96xf32> to vector<2x96xf32>
    %162 = arith.addf %160, %161 : vector<2x96xf32>
    %163 = vector.extract_strided_slice %162 {offsets = [0, 0], sizes = [2, 24], strides = [1, 1]} : vector<2x96xf32> to vector<2x24xf32>
    %164 = arith.negf %163 : vector<2x24xf32>
    %165 = math.exp %164 : vector<2x24xf32>
    %cst_41 = arith.constant 1.000000e+00 : f32
    %166 = vector.broadcast %cst_41 : f32 to vector<2x24xf32>
    %167 = arith.addf %166, %165 : vector<2x24xf32>
    %168 = arith.divf %166, %167 : vector<2x24xf32>
    %169 = vector.extract_strided_slice %162 {offsets = [0, 24], sizes = [2, 24], strides = [1, 1]} : vector<2x96xf32> to vector<2x24xf32>
    %170 = arith.negf %169 : vector<2x24xf32>
    %171 = math.exp %170 : vector<2x24xf32>
    %cst_42 = arith.constant 1.000000e+00 : f32
    %172 = vector.broadcast %cst_42 : f32 to vector<2x24xf32>
    %173 = arith.addf %172, %171 : vector<2x24xf32>
    %174 = arith.divf %172, %173 : vector<2x24xf32>
    %175 = vector.extract_strided_slice %162 {offsets = [0, 48], sizes = [2, 24], strides = [1, 1]} : vector<2x96xf32> to vector<2x24xf32>
    %176 = math.tanh %175 : vector<2x24xf32>
    %177 = vector.extract_strided_slice %162 {offsets = [0, 72], sizes = [2, 24], strides = [1, 1]} : vector<2x96xf32> to vector<2x24xf32>
    %178 = arith.negf %177 : vector<2x24xf32>
    %179 = math.exp %178 : vector<2x24xf32>
    %cst_43 = arith.constant 1.000000e+00 : f32
    %180 = vector.broadcast %cst_43 : f32 to vector<2x24xf32>
    %181 = arith.addf %180, %179 : vector<2x24xf32>
    %182 = arith.divf %180, %181 : vector<2x24xf32>
    %183 = arith.mulf %174, %127 : vector<2x24xf32>
    %184 = arith.mulf %168, %176 : vector<2x24xf32>
    %185 = arith.addf %183, %184 : vector<2x24xf32>
    %186 = math.tanh %185 : vector<2x24xf32>
    %187 = arith.mulf %182, %186 : vector<2x24xf32>
    %188 = vector.extract_strided_slice %5 {offsets = [6, 0], sizes = [2, 128], strides = [1, 1]} : vector<16x128xf32> to vector<2x128xf32>
    %cst_44 = arith.constant dense<0.000000e+00> : vector<2x128xf32>
    %189 = tpu.matmul %157, %6, %cst_44 {dimension_numbers = #tpu.dot_dimension_numbers<[1], [0], [0], [1], [0, 0, 1, 1], [], []>} : vector<2x32xf32>, vector<32x128xf32>, vector<2x128xf32> -> vector<2x128xf32>
    %190 = arith.addf %188, %189 : vector<2x128xf32>
    %191 = vector.extract_strided_slice %190 {offsets = [0, 0], sizes = [2, 32], strides = [1, 1]} : vector<2x128xf32> to vector<2x32xf32>
    %192 = arith.negf %191 : vector<2x32xf32>
    %193 = math.exp %192 : vector<2x32xf32>
    %cst_45 = arith.constant 1.000000e+00 : f32
    %194 = vector.broadcast %cst_45 : f32 to vector<2x32xf32>
    %195 = arith.addf %194, %193 : vector<2x32xf32>
    %196 = arith.divf %194, %195 : vector<2x32xf32>
    %197 = vector.extract_strided_slice %190 {offsets = [0, 32], sizes = [2, 32], strides = [1, 1]} : vector<2x128xf32> to vector<2x32xf32>
    %198 = arith.negf %197 : vector<2x32xf32>
    %199 = math.exp %198 : vector<2x32xf32>
    %cst_46 = arith.constant 1.000000e+00 : f32
    %200 = vector.broadcast %cst_46 : f32 to vector<2x32xf32>
    %201 = arith.addf %200, %199 : vector<2x32xf32>
    %202 = arith.divf %200, %201 : vector<2x32xf32>
    %203 = vector.extract_strided_slice %190 {offsets = [0, 64], sizes = [2, 32], strides = [1, 1]} : vector<2x128xf32> to vector<2x32xf32>
    %204 = math.tanh %203 : vector<2x32xf32>
    %205 = vector.extract_strided_slice %190 {offsets = [0, 96], sizes = [2, 32], strides = [1, 1]} : vector<2x128xf32> to vector<2x32xf32>
    %206 = arith.negf %205 : vector<2x32xf32>
    %207 = math.exp %206 : vector<2x32xf32>
    %cst_47 = arith.constant 1.000000e+00 : f32
    %208 = vector.broadcast %cst_47 : f32 to vector<2x32xf32>
    %209 = arith.addf %208, %207 : vector<2x32xf32>
    %210 = arith.divf %208, %209 : vector<2x32xf32>
    %211 = arith.mulf %202, %155 : vector<2x32xf32>
    %212 = arith.mulf %196, %204 : vector<2x32xf32>
    %213 = arith.addf %211, %212 : vector<2x32xf32>
    %214 = math.tanh %213 : vector<2x32xf32>
    %215 = arith.mulf %210, %214 : vector<2x32xf32>
    %cst_48 = arith.constant dense<0.000000e+00> : vector<2x96xf32>
    %216 = tpu.matmul %215, %7, %cst_48 {dimension_numbers = #tpu.dot_dimension_numbers<[1], [0], [0], [1], [0, 0, 1, 1], [], []>} : vector<2x32xf32>, vector<32x96xf32>, vector<2x96xf32> -> vector<2x96xf32>
    %cst_49 = arith.constant dense<0.000000e+00> : vector<2x96xf32>
    %217 = tpu.matmul %187, %8, %cst_49 {dimension_numbers = #tpu.dot_dimension_numbers<[1], [0], [0], [1], [0, 0, 1, 1], [], []>} : vector<2x24xf32>, vector<24x96xf32>, vector<2x96xf32> -> vector<2x96xf32>
    %218 = arith.addf %216, %217 : vector<2x96xf32>
    %219 = vector.broadcast %9 : vector<1x96xf32> to vector<2x96xf32>
    %220 = arith.addf %218, %219 : vector<2x96xf32>
    %221 = vector.extract_strided_slice %220 {offsets = [0, 0], sizes = [2, 24], strides = [1, 1]} : vector<2x96xf32> to vector<2x24xf32>
    %222 = arith.negf %221 : vector<2x24xf32>
    %223 = math.exp %222 : vector<2x24xf32>
    %cst_50 = arith.constant 1.000000e+00 : f32
    %224 = vector.broadcast %cst_50 : f32 to vector<2x24xf32>
    %225 = arith.addf %224, %223 : vector<2x24xf32>
    %226 = arith.divf %224, %225 : vector<2x24xf32>
    %227 = vector.extract_strided_slice %220 {offsets = [0, 24], sizes = [2, 24], strides = [1, 1]} : vector<2x96xf32> to vector<2x24xf32>
    %228 = arith.negf %227 : vector<2x24xf32>
    %229 = math.exp %228 : vector<2x24xf32>
    %cst_51 = arith.constant 1.000000e+00 : f32
    %230 = vector.broadcast %cst_51 : f32 to vector<2x24xf32>
    %231 = arith.addf %230, %229 : vector<2x24xf32>
    %232 = arith.divf %230, %231 : vector<2x24xf32>
    %233 = vector.extract_strided_slice %220 {offsets = [0, 48], sizes = [2, 24], strides = [1, 1]} : vector<2x96xf32> to vector<2x24xf32>
    %234 = math.tanh %233 : vector<2x24xf32>
    %235 = vector.extract_strided_slice %220 {offsets = [0, 72], sizes = [2, 24], strides = [1, 1]} : vector<2x96xf32> to vector<2x24xf32>
    %236 = arith.negf %235 : vector<2x24xf32>
    %237 = math.exp %236 : vector<2x24xf32>
    %cst_52 = arith.constant 1.000000e+00 : f32
    %238 = vector.broadcast %cst_52 : f32 to vector<2x24xf32>
    %239 = arith.addf %238, %237 : vector<2x24xf32>
    %240 = arith.divf %238, %239 : vector<2x24xf32>
    %241 = arith.mulf %232, %185 : vector<2x24xf32>
    %242 = arith.mulf %226, %234 : vector<2x24xf32>
    %243 = arith.addf %241, %242 : vector<2x24xf32>
    %244 = math.tanh %243 : vector<2x24xf32>
    %245 = arith.mulf %240, %244 : vector<2x24xf32>
    %246 = vector.extract_strided_slice %5 {offsets = [8, 0], sizes = [2, 128], strides = [1, 1]} : vector<16x128xf32> to vector<2x128xf32>
    %cst_53 = arith.constant dense<0.000000e+00> : vector<2x128xf32>
    %247 = tpu.matmul %215, %6, %cst_53 {dimension_numbers = #tpu.dot_dimension_numbers<[1], [0], [0], [1], [0, 0, 1, 1], [], []>} : vector<2x32xf32>, vector<32x128xf32>, vector<2x128xf32> -> vector<2x128xf32>
    %248 = arith.addf %246, %247 : vector<2x128xf32>
    %249 = vector.extract_strided_slice %248 {offsets = [0, 0], sizes = [2, 32], strides = [1, 1]} : vector<2x128xf32> to vector<2x32xf32>
    %250 = arith.negf %249 : vector<2x32xf32>
    %251 = math.exp %250 : vector<2x32xf32>
    %cst_54 = arith.constant 1.000000e+00 : f32
    %252 = vector.broadcast %cst_54 : f32 to vector<2x32xf32>
    %253 = arith.addf %252, %251 : vector<2x32xf32>
    %254 = arith.divf %252, %253 : vector<2x32xf32>
    %255 = vector.extract_strided_slice %248 {offsets = [0, 32], sizes = [2, 32], strides = [1, 1]} : vector<2x128xf32> to vector<2x32xf32>
    %256 = arith.negf %255 : vector<2x32xf32>
    %257 = math.exp %256 : vector<2x32xf32>
    %cst_55 = arith.constant 1.000000e+00 : f32
    %258 = vector.broadcast %cst_55 : f32 to vector<2x32xf32>
    %259 = arith.addf %258, %257 : vector<2x32xf32>
    %260 = arith.divf %258, %259 : vector<2x32xf32>
    %261 = vector.extract_strided_slice %248 {offsets = [0, 64], sizes = [2, 32], strides = [1, 1]} : vector<2x128xf32> to vector<2x32xf32>
    %262 = math.tanh %261 : vector<2x32xf32>
    %263 = vector.extract_strided_slice %248 {offsets = [0, 96], sizes = [2, 32], strides = [1, 1]} : vector<2x128xf32> to vector<2x32xf32>
    %264 = arith.negf %263 : vector<2x32xf32>
    %265 = math.exp %264 : vector<2x32xf32>
    %cst_56 = arith.constant 1.000000e+00 : f32
    %266 = vector.broadcast %cst_56 : f32 to vector<2x32xf32>
    %267 = arith.addf %266, %265 : vector<2x32xf32>
    %268 = arith.divf %266, %267 : vector<2x32xf32>
    %269 = arith.mulf %260, %213 : vector<2x32xf32>
    %270 = arith.mulf %254, %262 : vector<2x32xf32>
    %271 = arith.addf %269, %270 : vector<2x32xf32>
    %272 = math.tanh %271 : vector<2x32xf32>
    %273 = arith.mulf %268, %272 : vector<2x32xf32>
    %cst_57 = arith.constant dense<0.000000e+00> : vector<2x96xf32>
    %274 = tpu.matmul %273, %7, %cst_57 {dimension_numbers = #tpu.dot_dimension_numbers<[1], [0], [0], [1], [0, 0, 1, 1], [], []>} : vector<2x32xf32>, vector<32x96xf32>, vector<2x96xf32> -> vector<2x96xf32>
    %cst_58 = arith.constant dense<0.000000e+00> : vector<2x96xf32>
    %275 = tpu.matmul %245, %8, %cst_58 {dimension_numbers = #tpu.dot_dimension_numbers<[1], [0], [0], [1], [0, 0, 1, 1], [], []>} : vector<2x24xf32>, vector<24x96xf32>, vector<2x96xf32> -> vector<2x96xf32>
    %276 = arith.addf %274, %275 : vector<2x96xf32>
    %277 = vector.broadcast %9 : vector<1x96xf32> to vector<2x96xf32>
    %278 = arith.addf %276, %277 : vector<2x96xf32>
    %279 = vector.extract_strided_slice %278 {offsets = [0, 0], sizes = [2, 24], strides = [1, 1]} : vector<2x96xf32> to vector<2x24xf32>
    %280 = arith.negf %279 : vector<2x24xf32>
    %281 = math.exp %280 : vector<2x24xf32>
    %cst_59 = arith.constant 1.000000e+00 : f32
    %282 = vector.broadcast %cst_59 : f32 to vector<2x24xf32>
    %283 = arith.addf %282, %281 : vector<2x24xf32>
    %284 = arith.divf %282, %283 : vector<2x24xf32>
    %285 = vector.extract_strided_slice %278 {offsets = [0, 24], sizes = [2, 24], strides = [1, 1]} : vector<2x96xf32> to vector<2x24xf32>
    %286 = arith.negf %285 : vector<2x24xf32>
    %287 = math.exp %286 : vector<2x24xf32>
    %cst_60 = arith.constant 1.000000e+00 : f32
    %288 = vector.broadcast %cst_60 : f32 to vector<2x24xf32>
    %289 = arith.addf %288, %287 : vector<2x24xf32>
    %290 = arith.divf %288, %289 : vector<2x24xf32>
    %291 = vector.extract_strided_slice %278 {offsets = [0, 48], sizes = [2, 24], strides = [1, 1]} : vector<2x96xf32> to vector<2x24xf32>
    %292 = math.tanh %291 : vector<2x24xf32>
    %293 = vector.extract_strided_slice %278 {offsets = [0, 72], sizes = [2, 24], strides = [1, 1]} : vector<2x96xf32> to vector<2x24xf32>
    %294 = arith.negf %293 : vector<2x24xf32>
    %295 = math.exp %294 : vector<2x24xf32>
    %cst_61 = arith.constant 1.000000e+00 : f32
    %296 = vector.broadcast %cst_61 : f32 to vector<2x24xf32>
    %297 = arith.addf %296, %295 : vector<2x24xf32>
    %298 = arith.divf %296, %297 : vector<2x24xf32>
    %299 = arith.mulf %290, %243 : vector<2x24xf32>
    %300 = arith.mulf %284, %292 : vector<2x24xf32>
    %301 = arith.addf %299, %300 : vector<2x24xf32>
    %302 = math.tanh %301 : vector<2x24xf32>
    %303 = arith.mulf %298, %302 : vector<2x24xf32>
    %304 = vector.extract_strided_slice %5 {offsets = [10, 0], sizes = [2, 128], strides = [1, 1]} : vector<16x128xf32> to vector<2x128xf32>
    %cst_62 = arith.constant dense<0.000000e+00> : vector<2x128xf32>
    %305 = tpu.matmul %273, %6, %cst_62 {dimension_numbers = #tpu.dot_dimension_numbers<[1], [0], [0], [1], [0, 0, 1, 1], [], []>} : vector<2x32xf32>, vector<32x128xf32>, vector<2x128xf32> -> vector<2x128xf32>
    %306 = arith.addf %304, %305 : vector<2x128xf32>
    %307 = vector.extract_strided_slice %306 {offsets = [0, 0], sizes = [2, 32], strides = [1, 1]} : vector<2x128xf32> to vector<2x32xf32>
    %308 = arith.negf %307 : vector<2x32xf32>
    %309 = math.exp %308 : vector<2x32xf32>
    %cst_63 = arith.constant 1.000000e+00 : f32
    %310 = vector.broadcast %cst_63 : f32 to vector<2x32xf32>
    %311 = arith.addf %310, %309 : vector<2x32xf32>
    %312 = arith.divf %310, %311 : vector<2x32xf32>
    %313 = vector.extract_strided_slice %306 {offsets = [0, 32], sizes = [2, 32], strides = [1, 1]} : vector<2x128xf32> to vector<2x32xf32>
    %314 = arith.negf %313 : vector<2x32xf32>
    %315 = math.exp %314 : vector<2x32xf32>
    %cst_64 = arith.constant 1.000000e+00 : f32
    %316 = vector.broadcast %cst_64 : f32 to vector<2x32xf32>
    %317 = arith.addf %316, %315 : vector<2x32xf32>
    %318 = arith.divf %316, %317 : vector<2x32xf32>
    %319 = vector.extract_strided_slice %306 {offsets = [0, 64], sizes = [2, 32], strides = [1, 1]} : vector<2x128xf32> to vector<2x32xf32>
    %320 = math.tanh %319 : vector<2x32xf32>
    %321 = vector.extract_strided_slice %306 {offsets = [0, 96], sizes = [2, 32], strides = [1, 1]} : vector<2x128xf32> to vector<2x32xf32>
    %322 = arith.negf %321 : vector<2x32xf32>
    %323 = math.exp %322 : vector<2x32xf32>
    %cst_65 = arith.constant 1.000000e+00 : f32
    %324 = vector.broadcast %cst_65 : f32 to vector<2x32xf32>
    %325 = arith.addf %324, %323 : vector<2x32xf32>
    %326 = arith.divf %324, %325 : vector<2x32xf32>
    %327 = arith.mulf %318, %271 : vector<2x32xf32>
    %328 = arith.mulf %312, %320 : vector<2x32xf32>
    %329 = arith.addf %327, %328 : vector<2x32xf32>
    %330 = math.tanh %329 : vector<2x32xf32>
    %331 = arith.mulf %326, %330 : vector<2x32xf32>
    %cst_66 = arith.constant dense<0.000000e+00> : vector<2x96xf32>
    %332 = tpu.matmul %331, %7, %cst_66 {dimension_numbers = #tpu.dot_dimension_numbers<[1], [0], [0], [1], [0, 0, 1, 1], [], []>} : vector<2x32xf32>, vector<32x96xf32>, vector<2x96xf32> -> vector<2x96xf32>
    %cst_67 = arith.constant dense<0.000000e+00> : vector<2x96xf32>
    %333 = tpu.matmul %303, %8, %cst_67 {dimension_numbers = #tpu.dot_dimension_numbers<[1], [0], [0], [1], [0, 0, 1, 1], [], []>} : vector<2x24xf32>, vector<24x96xf32>, vector<2x96xf32> -> vector<2x96xf32>
    %334 = arith.addf %332, %333 : vector<2x96xf32>
    %335 = vector.broadcast %9 : vector<1x96xf32> to vector<2x96xf32>
    %336 = arith.addf %334, %335 : vector<2x96xf32>
    %337 = vector.extract_strided_slice %336 {offsets = [0, 0], sizes = [2, 24], strides = [1, 1]} : vector<2x96xf32> to vector<2x24xf32>
    %338 = arith.negf %337 : vector<2x24xf32>
    %339 = math.exp %338 : vector<2x24xf32>
    %cst_68 = arith.constant 1.000000e+00 : f32
    %340 = vector.broadcast %cst_68 : f32 to vector<2x24xf32>
    %341 = arith.addf %340, %339 : vector<2x24xf32>
    %342 = arith.divf %340, %341 : vector<2x24xf32>
    %343 = vector.extract_strided_slice %336 {offsets = [0, 24], sizes = [2, 24], strides = [1, 1]} : vector<2x96xf32> to vector<2x24xf32>
    %344 = arith.negf %343 : vector<2x24xf32>
    %345 = math.exp %344 : vector<2x24xf32>
    %cst_69 = arith.constant 1.000000e+00 : f32
    %346 = vector.broadcast %cst_69 : f32 to vector<2x24xf32>
    %347 = arith.addf %346, %345 : vector<2x24xf32>
    %348 = arith.divf %346, %347 : vector<2x24xf32>
    %349 = vector.extract_strided_slice %336 {offsets = [0, 48], sizes = [2, 24], strides = [1, 1]} : vector<2x96xf32> to vector<2x24xf32>
    %350 = math.tanh %349 : vector<2x24xf32>
    %351 = vector.extract_strided_slice %336 {offsets = [0, 72], sizes = [2, 24], strides = [1, 1]} : vector<2x96xf32> to vector<2x24xf32>
    %352 = arith.negf %351 : vector<2x24xf32>
    %353 = math.exp %352 : vector<2x24xf32>
    %cst_70 = arith.constant 1.000000e+00 : f32
    %354 = vector.broadcast %cst_70 : f32 to vector<2x24xf32>
    %355 = arith.addf %354, %353 : vector<2x24xf32>
    %356 = arith.divf %354, %355 : vector<2x24xf32>
    %357 = arith.mulf %348, %301 : vector<2x24xf32>
    %358 = arith.mulf %342, %350 : vector<2x24xf32>
    %359 = arith.addf %357, %358 : vector<2x24xf32>
    %360 = math.tanh %359 : vector<2x24xf32>
    %361 = arith.mulf %356, %360 : vector<2x24xf32>
    %362 = vector.extract_strided_slice %5 {offsets = [12, 0], sizes = [2, 128], strides = [1, 1]} : vector<16x128xf32> to vector<2x128xf32>
    %cst_71 = arith.constant dense<0.000000e+00> : vector<2x128xf32>
    %363 = tpu.matmul %331, %6, %cst_71 {dimension_numbers = #tpu.dot_dimension_numbers<[1], [0], [0], [1], [0, 0, 1, 1], [], []>} : vector<2x32xf32>, vector<32x128xf32>, vector<2x128xf32> -> vector<2x128xf32>
    %364 = arith.addf %362, %363 : vector<2x128xf32>
    %365 = vector.extract_strided_slice %364 {offsets = [0, 0], sizes = [2, 32], strides = [1, 1]} : vector<2x128xf32> to vector<2x32xf32>
    %366 = arith.negf %365 : vector<2x32xf32>
    %367 = math.exp %366 : vector<2x32xf32>
    %cst_72 = arith.constant 1.000000e+00 : f32
    %368 = vector.broadcast %cst_72 : f32 to vector<2x32xf32>
    %369 = arith.addf %368, %367 : vector<2x32xf32>
    %370 = arith.divf %368, %369 : vector<2x32xf32>
    %371 = vector.extract_strided_slice %364 {offsets = [0, 32], sizes = [2, 32], strides = [1, 1]} : vector<2x128xf32> to vector<2x32xf32>
    %372 = arith.negf %371 : vector<2x32xf32>
    %373 = math.exp %372 : vector<2x32xf32>
    %cst_73 = arith.constant 1.000000e+00 : f32
    %374 = vector.broadcast %cst_73 : f32 to vector<2x32xf32>
    %375 = arith.addf %374, %373 : vector<2x32xf32>
    %376 = arith.divf %374, %375 : vector<2x32xf32>
    %377 = vector.extract_strided_slice %364 {offsets = [0, 64], sizes = [2, 32], strides = [1, 1]} : vector<2x128xf32> to vector<2x32xf32>
    %378 = math.tanh %377 : vector<2x32xf32>
    %379 = vector.extract_strided_slice %364 {offsets = [0, 96], sizes = [2, 32], strides = [1, 1]} : vector<2x128xf32> to vector<2x32xf32>
    %380 = arith.negf %379 : vector<2x32xf32>
    %381 = math.exp %380 : vector<2x32xf32>
    %cst_74 = arith.constant 1.000000e+00 : f32
    %382 = vector.broadcast %cst_74 : f32 to vector<2x32xf32>
    %383 = arith.addf %382, %381 : vector<2x32xf32>
    %384 = arith.divf %382, %383 : vector<2x32xf32>
    %385 = arith.mulf %376, %329 : vector<2x32xf32>
    %386 = arith.mulf %370, %378 : vector<2x32xf32>
    %387 = arith.addf %385, %386 : vector<2x32xf32>
    %388 = math.tanh %387 : vector<2x32xf32>
    %389 = arith.mulf %384, %388 : vector<2x32xf32>
    %cst_75 = arith.constant dense<0.000000e+00> : vector<2x96xf32>
    %390 = tpu.matmul %389, %7, %cst_75 {dimension_numbers = #tpu.dot_dimension_numbers<[1], [0], [0], [1], [0, 0, 1, 1], [], []>} : vector<2x32xf32>, vector<32x96xf32>, vector<2x96xf32> -> vector<2x96xf32>
    %cst_76 = arith.constant dense<0.000000e+00> : vector<2x96xf32>
    %391 = tpu.matmul %361, %8, %cst_76 {dimension_numbers = #tpu.dot_dimension_numbers<[1], [0], [0], [1], [0, 0, 1, 1], [], []>} : vector<2x24xf32>, vector<24x96xf32>, vector<2x96xf32> -> vector<2x96xf32>
    %392 = arith.addf %390, %391 : vector<2x96xf32>
    %393 = vector.broadcast %9 : vector<1x96xf32> to vector<2x96xf32>
    %394 = arith.addf %392, %393 : vector<2x96xf32>
    %395 = vector.extract_strided_slice %394 {offsets = [0, 0], sizes = [2, 24], strides = [1, 1]} : vector<2x96xf32> to vector<2x24xf32>
    %396 = arith.negf %395 : vector<2x24xf32>
    %397 = math.exp %396 : vector<2x24xf32>
    %cst_77 = arith.constant 1.000000e+00 : f32
    %398 = vector.broadcast %cst_77 : f32 to vector<2x24xf32>
    %399 = arith.addf %398, %397 : vector<2x24xf32>
    %400 = arith.divf %398, %399 : vector<2x24xf32>
    %401 = vector.extract_strided_slice %394 {offsets = [0, 24], sizes = [2, 24], strides = [1, 1]} : vector<2x96xf32> to vector<2x24xf32>
    %402 = arith.negf %401 : vector<2x24xf32>
    %403 = math.exp %402 : vector<2x24xf32>
    %cst_78 = arith.constant 1.000000e+00 : f32
    %404 = vector.broadcast %cst_78 : f32 to vector<2x24xf32>
    %405 = arith.addf %404, %403 : vector<2x24xf32>
    %406 = arith.divf %404, %405 : vector<2x24xf32>
    %407 = vector.extract_strided_slice %394 {offsets = [0, 48], sizes = [2, 24], strides = [1, 1]} : vector<2x96xf32> to vector<2x24xf32>
    %408 = math.tanh %407 : vector<2x24xf32>
    %409 = vector.extract_strided_slice %394 {offsets = [0, 72], sizes = [2, 24], strides = [1, 1]} : vector<2x96xf32> to vector<2x24xf32>
    %410 = arith.negf %409 : vector<2x24xf32>
    %411 = math.exp %410 : vector<2x24xf32>
    %cst_79 = arith.constant 1.000000e+00 : f32
    %412 = vector.broadcast %cst_79 : f32 to vector<2x24xf32>
    %413 = arith.addf %412, %411 : vector<2x24xf32>
    %414 = arith.divf %412, %413 : vector<2x24xf32>
    %415 = arith.mulf %406, %359 : vector<2x24xf32>
    %416 = arith.mulf %400, %408 : vector<2x24xf32>
    %417 = arith.addf %415, %416 : vector<2x24xf32>
    %418 = math.tanh %417 : vector<2x24xf32>
    %419 = arith.mulf %414, %418 : vector<2x24xf32>
    %420 = vector.extract_strided_slice %5 {offsets = [14, 0], sizes = [2, 128], strides = [1, 1]} : vector<16x128xf32> to vector<2x128xf32>
    %cst_80 = arith.constant dense<0.000000e+00> : vector<2x128xf32>
    %421 = tpu.matmul %389, %6, %cst_80 {dimension_numbers = #tpu.dot_dimension_numbers<[1], [0], [0], [1], [0, 0, 1, 1], [], []>} : vector<2x32xf32>, vector<32x128xf32>, vector<2x128xf32> -> vector<2x128xf32>
    %422 = arith.addf %420, %421 : vector<2x128xf32>
    %423 = vector.extract_strided_slice %422 {offsets = [0, 0], sizes = [2, 32], strides = [1, 1]} : vector<2x128xf32> to vector<2x32xf32>
    %424 = arith.negf %423 : vector<2x32xf32>
    %425 = math.exp %424 : vector<2x32xf32>
    %cst_81 = arith.constant 1.000000e+00 : f32
    %426 = vector.broadcast %cst_81 : f32 to vector<2x32xf32>
    %427 = arith.addf %426, %425 : vector<2x32xf32>
    %428 = arith.divf %426, %427 : vector<2x32xf32>
    %429 = vector.extract_strided_slice %422 {offsets = [0, 32], sizes = [2, 32], strides = [1, 1]} : vector<2x128xf32> to vector<2x32xf32>
    %430 = arith.negf %429 : vector<2x32xf32>
    %431 = math.exp %430 : vector<2x32xf32>
    %cst_82 = arith.constant 1.000000e+00 : f32
    %432 = vector.broadcast %cst_82 : f32 to vector<2x32xf32>
    %433 = arith.addf %432, %431 : vector<2x32xf32>
    %434 = arith.divf %432, %433 : vector<2x32xf32>
    %435 = vector.extract_strided_slice %422 {offsets = [0, 64], sizes = [2, 32], strides = [1, 1]} : vector<2x128xf32> to vector<2x32xf32>
    %436 = math.tanh %435 : vector<2x32xf32>
    %437 = vector.extract_strided_slice %422 {offsets = [0, 96], sizes = [2, 32], strides = [1, 1]} : vector<2x128xf32> to vector<2x32xf32>
    %438 = arith.negf %437 : vector<2x32xf32>
    %439 = math.exp %438 : vector<2x32xf32>
    %cst_83 = arith.constant 1.000000e+00 : f32
    %440 = vector.broadcast %cst_83 : f32 to vector<2x32xf32>
    %441 = arith.addf %440, %439 : vector<2x32xf32>
    %442 = arith.divf %440, %441 : vector<2x32xf32>
    %443 = arith.mulf %434, %387 : vector<2x32xf32>
    %444 = arith.mulf %428, %436 : vector<2x32xf32>
    %445 = arith.addf %443, %444 : vector<2x32xf32>
    %446 = math.tanh %445 : vector<2x32xf32>
    %447 = arith.mulf %442, %446 : vector<2x32xf32>
    %cst_84 = arith.constant dense<0.000000e+00> : vector<2x96xf32>
    %448 = tpu.matmul %447, %7, %cst_84 {dimension_numbers = #tpu.dot_dimension_numbers<[1], [0], [0], [1], [0, 0, 1, 1], [], []>} : vector<2x32xf32>, vector<32x96xf32>, vector<2x96xf32> -> vector<2x96xf32>
    %cst_85 = arith.constant dense<0.000000e+00> : vector<2x96xf32>
    %449 = tpu.matmul %419, %8, %cst_85 {dimension_numbers = #tpu.dot_dimension_numbers<[1], [0], [0], [1], [0, 0, 1, 1], [], []>} : vector<2x24xf32>, vector<24x96xf32>, vector<2x96xf32> -> vector<2x96xf32>
    %450 = arith.addf %448, %449 : vector<2x96xf32>
    %451 = vector.broadcast %9 : vector<1x96xf32> to vector<2x96xf32>
    %452 = arith.addf %450, %451 : vector<2x96xf32>
    %453 = vector.extract_strided_slice %452 {offsets = [0, 0], sizes = [2, 24], strides = [1, 1]} : vector<2x96xf32> to vector<2x24xf32>
    %454 = arith.negf %453 : vector<2x24xf32>
    %455 = math.exp %454 : vector<2x24xf32>
    %cst_86 = arith.constant 1.000000e+00 : f32
    %456 = vector.broadcast %cst_86 : f32 to vector<2x24xf32>
    %457 = arith.addf %456, %455 : vector<2x24xf32>
    %458 = arith.divf %456, %457 : vector<2x24xf32>
    %459 = vector.extract_strided_slice %452 {offsets = [0, 24], sizes = [2, 24], strides = [1, 1]} : vector<2x96xf32> to vector<2x24xf32>
    %460 = arith.negf %459 : vector<2x24xf32>
    %461 = math.exp %460 : vector<2x24xf32>
    %cst_87 = arith.constant 1.000000e+00 : f32
    %462 = vector.broadcast %cst_87 : f32 to vector<2x24xf32>
    %463 = arith.addf %462, %461 : vector<2x24xf32>
    %464 = arith.divf %462, %463 : vector<2x24xf32>
    %465 = vector.extract_strided_slice %452 {offsets = [0, 48], sizes = [2, 24], strides = [1, 1]} : vector<2x96xf32> to vector<2x24xf32>
    %466 = math.tanh %465 : vector<2x24xf32>
    %467 = vector.extract_strided_slice %452 {offsets = [0, 72], sizes = [2, 24], strides = [1, 1]} : vector<2x96xf32> to vector<2x24xf32>
    %468 = arith.negf %467 : vector<2x24xf32>
    %469 = math.exp %468 : vector<2x24xf32>
    %cst_88 = arith.constant 1.000000e+00 : f32
    %470 = vector.broadcast %cst_88 : f32 to vector<2x24xf32>
    %471 = arith.addf %470, %469 : vector<2x24xf32>
    %472 = arith.divf %470, %471 : vector<2x24xf32>
    %473 = arith.mulf %464, %417 : vector<2x24xf32>
    %474 = arith.mulf %458, %466 : vector<2x24xf32>
    %475 = arith.addf %473, %474 : vector<2x24xf32>
    %476 = math.tanh %475 : vector<2x24xf32>
    %477 = arith.mulf %472, %476 : vector<2x24xf32>
    %c0_89 = arith.constant 0 : index
    %c0_90 = arith.constant 0 : index
    %478 = vector.load %arg7[%c0_89, %c0_90] : memref<24x64xf32, #tpu.memory_space<vmem>>, vector<24x64xf32>
    %c0_91 = arith.constant 0 : index
    %c0_92 = arith.constant 0 : index
    %479 = vector.load %arg8[%c0_91, %c0_92] : memref<16x64xf32, #tpu.memory_space<vmem>>, vector<16x64xf32>
    %c0_93 = arith.constant 0 : index
    %c0_94 = arith.constant 0 : index
    %480 = vector.load %arg9[%c0_93, %c0_94] : memref<1x64xf32, #tpu.memory_space<vmem>>, vector<1x64xf32>
    %c0_95 = arith.constant 0 : index
    %c0_96 = arith.constant 0 : index
    %481 = vector.load %arg10[%c0_95, %c0_96] : memref<16x1xf32, #tpu.memory_space<vmem>>, vector<16x1xf32>
    %c0_97 = arith.constant 0 : index
    %c0_98 = arith.constant 0 : index
    %482 = vector.load %arg11[%c0_97, %c0_98] : memref<1x1xf32, #tpu.memory_space<vmem>>, vector<1x1xf32>
    %cst_99 = arith.constant 0.000000e+00 : f32
    %483 = vector.broadcast %cst_99 : f32 to vector<1x16xf32>
    %cst_100 = arith.constant 0.000000e+00 : f32
    %484 = vector.broadcast %cst_100 : f32 to vector<1x16xf32>
    %485 = vector.extract_strided_slice %477 {offsets = [0, 0], sizes = [1, 24], strides = [1, 1]} : vector<2x24xf32> to vector<1x24xf32>
    %cst_101 = arith.constant dense<0.000000e+00> : vector<1x64xf32>
    %486 = tpu.matmul %485, %478, %cst_101 {dimension_numbers = #tpu.dot_dimension_numbers<[1], [0], [0], [1], [0, 0, 1, 1], [], []>} : vector<1x24xf32>, vector<24x64xf32>, vector<1x64xf32> -> vector<1x64xf32>
    %cst_102 = arith.constant dense<0.000000e+00> : vector<1x64xf32>
    %487 = tpu.matmul %483, %479, %cst_102 {dimension_numbers = #tpu.dot_dimension_numbers<[1], [0], [0], [1], [0, 0, 1, 1], [], []>} : vector<1x16xf32>, vector<16x64xf32>, vector<1x64xf32> -> vector<1x64xf32>
    %488 = arith.addf %486, %487 : vector<1x64xf32>
    %489 = arith.addf %488, %480 : vector<1x64xf32>
    %490 = vector.extract_strided_slice %489 {offsets = [0, 0], sizes = [1, 16], strides = [1, 1]} : vector<1x64xf32> to vector<1x16xf32>
    %491 = arith.negf %490 : vector<1x16xf32>
    %492 = math.exp %491 : vector<1x16xf32>
    %cst_103 = arith.constant 1.000000e+00 : f32
    %493 = vector.broadcast %cst_103 : f32 to vector<1x16xf32>
    %494 = arith.addf %493, %492 : vector<1x16xf32>
    %495 = arith.divf %493, %494 : vector<1x16xf32>
    %496 = vector.extract_strided_slice %489 {offsets = [0, 16], sizes = [1, 16], strides = [1, 1]} : vector<1x64xf32> to vector<1x16xf32>
    %497 = arith.negf %496 : vector<1x16xf32>
    %498 = math.exp %497 : vector<1x16xf32>
    %cst_104 = arith.constant 1.000000e+00 : f32
    %499 = vector.broadcast %cst_104 : f32 to vector<1x16xf32>
    %500 = arith.addf %499, %498 : vector<1x16xf32>
    %501 = arith.divf %499, %500 : vector<1x16xf32>
    %502 = vector.extract_strided_slice %489 {offsets = [0, 32], sizes = [1, 16], strides = [1, 1]} : vector<1x64xf32> to vector<1x16xf32>
    %503 = math.tanh %502 : vector<1x16xf32>
    %504 = vector.extract_strided_slice %489 {offsets = [0, 48], sizes = [1, 16], strides = [1, 1]} : vector<1x64xf32> to vector<1x16xf32>
    %505 = arith.negf %504 : vector<1x16xf32>
    %506 = math.exp %505 : vector<1x16xf32>
    %cst_105 = arith.constant 1.000000e+00 : f32
    %507 = vector.broadcast %cst_105 : f32 to vector<1x16xf32>
    %508 = arith.addf %507, %506 : vector<1x16xf32>
    %509 = arith.divf %507, %508 : vector<1x16xf32>
    %510 = arith.mulf %501, %484 : vector<1x16xf32>
    %511 = arith.mulf %495, %503 : vector<1x16xf32>
    %512 = arith.addf %510, %511 : vector<1x16xf32>
    %513 = math.tanh %512 : vector<1x16xf32>
    %514 = arith.mulf %509, %513 : vector<1x16xf32>
    %cst_106 = arith.constant dense<0.000000e+00> : vector<1x1xf32>
    %515 = tpu.matmul %514, %481, %cst_106 {dimension_numbers = #tpu.dot_dimension_numbers<[1], [0], [0], [1], [0, 0, 1, 1], [], []>} : vector<1x16xf32>, vector<16x1xf32>, vector<1x1xf32> -> vector<1x1xf32>
    %516 = arith.addf %515, %482 : vector<1x1xf32>
    %c0_107 = arith.constant 0 : index
    %c0_108 = arith.constant 0 : index
    %517 = vector.load %arg12[%c0_107, %c0_108] : memref<2x1xf32, #tpu.memory_space<vmem>>, vector<1x1xf32>
    tpu.vector_store %arg12[%c0_107, %c0_108], %516 {strides = array<i32>} : memref<2x1xf32, #tpu.memory_space<vmem>>, vector<1x1xf32>,
    %518 = vector.extract_strided_slice %477 {offsets = [1, 0], sizes = [1, 24], strides = [1, 1]} : vector<2x24xf32> to vector<1x24xf32>
    %cst_109 = arith.constant dense<0.000000e+00> : vector<1x64xf32>
    %519 = tpu.matmul %518, %478, %cst_109 {dimension_numbers = #tpu.dot_dimension_numbers<[1], [0], [0], [1], [0, 0, 1, 1], [], []>} : vector<1x24xf32>, vector<24x64xf32>, vector<1x64xf32> -> vector<1x64xf32>
    %cst_110 = arith.constant dense<0.000000e+00> : vector<1x64xf32>
    %520 = tpu.matmul %514, %479, %cst_110 {dimension_numbers = #tpu.dot_dimension_numbers<[1], [0], [0], [1], [0, 0, 1, 1], [], []>} : vector<1x16xf32>, vector<16x64xf32>, vector<1x64xf32> -> vector<1x64xf32>
    %521 = arith.addf %519, %520 : vector<1x64xf32>
    %522 = arith.addf %521, %480 : vector<1x64xf32>
    %523 = vector.extract_strided_slice %522 {offsets = [0, 0], sizes = [1, 16], strides = [1, 1]} : vector<1x64xf32> to vector<1x16xf32>
    %524 = arith.negf %523 : vector<1x16xf32>
    %525 = math.exp %524 : vector<1x16xf32>
    %cst_111 = arith.constant 1.000000e+00 : f32
    %526 = vector.broadcast %cst_111 : f32 to vector<1x16xf32>
    %527 = arith.addf %526, %525 : vector<1x16xf32>
    %528 = arith.divf %526, %527 : vector<1x16xf32>
    %529 = vector.extract_strided_slice %522 {offsets = [0, 16], sizes = [1, 16], strides = [1, 1]} : vector<1x64xf32> to vector<1x16xf32>
    %530 = arith.negf %529 : vector<1x16xf32>
    %531 = math.exp %530 : vector<1x16xf32>
    %cst_112 = arith.constant 1.000000e+00 : f32
    %532 = vector.broadcast %cst_112 : f32 to vector<1x16xf32>
    %533 = arith.addf %532, %531 : vector<1x16xf32>
    %534 = arith.divf %532, %533 : vector<1x16xf32>
    %535 = vector.extract_strided_slice %522 {offsets = [0, 32], sizes = [1, 16], strides = [1, 1]} : vector<1x64xf32> to vector<1x16xf32>
    %536 = math.tanh %535 : vector<1x16xf32>
    %537 = vector.extract_strided_slice %522 {offsets = [0, 48], sizes = [1, 16], strides = [1, 1]} : vector<1x64xf32> to vector<1x16xf32>
    %538 = arith.negf %537 : vector<1x16xf32>
    %539 = math.exp %538 : vector<1x16xf32>
    %cst_113 = arith.constant 1.000000e+00 : f32
    %540 = vector.broadcast %cst_113 : f32 to vector<1x16xf32>
    %541 = arith.addf %540, %539 : vector<1x16xf32>
    %542 = arith.divf %540, %541 : vector<1x16xf32>
    %543 = arith.mulf %534, %512 : vector<1x16xf32>
    %544 = arith.mulf %528, %536 : vector<1x16xf32>
    %545 = arith.addf %543, %544 : vector<1x16xf32>
    %546 = math.tanh %545 : vector<1x16xf32>
    %547 = arith.mulf %542, %546 : vector<1x16xf32>
    %cst_114 = arith.constant dense<0.000000e+00> : vector<1x1xf32>
    %548 = tpu.matmul %547, %481, %cst_114 {dimension_numbers = #tpu.dot_dimension_numbers<[1], [0], [0], [1], [0, 0, 1, 1], [], []>} : vector<1x16xf32>, vector<16x1xf32>, vector<1x1xf32> -> vector<1x1xf32>
    %549 = arith.addf %548, %482 : vector<1x1xf32>
    %c1 = arith.constant 1 : index
    %c0_115 = arith.constant 0 : index
    %550 = vector.load %arg12[%c1, %c0_115] : memref<2x1xf32, #tpu.memory_space<vmem>>, vector<1x1xf32>
    tpu.vector_store %arg12[%c1, %c0_115], %549 {strides = array<i32>} : memref<2x1xf32, #tpu.memory_space<vmem>>, vector<1x1xf32>,
    return
  }
}

</mosaic_0001>

<bundles_post_ra>
// kernel: tpu_custom_call.1
= control target key start
LH: loop header
LB: loop body
LE: loop exit
PB: predicated region body
PF: predicated region fallthrough
CT: control target
= control target key end

     0   :  { %s4355_s0 = inlined_call_operand.vmem [shape: f32[16,4], index: 0, kind: input, shape index: {}]   ;;  %s4356_s1 = inlined_call_operand.hbm [shape: f32[4,128], index: 1, kind: input, shape index: {}]   ;;  %s4357_s2 = inlined_call_operand.vmem [shape: f32[32,128], index: 2, kind: input, shape index: {}]   ;;  %s4358_s3 = inlined_call_operand.vmem [shape: f32[1,128], index: 3, kind: input, shape index: {}]   ;;  %s4359_s4 = inlined_call_operand.hbm [shape: f32[32,96], index: 4, kind: input, shape index: {}]   ;;  %s4360_s5 = inlined_call_operand.vmem [shape: f32[24,96], index: 5, kind: input, shape index: {}]   ;;  %s4361_s6 = inlined_call_operand.vmem [shape: f32[1,96], index: 6, kind: input, shape index: {}]   ;;  %s4362_s7 = inlined_call_operand.hbm [shape: f32[24,64], index: 7, kind: input, shape index: {}]   ;;  %s4363_s8 = inlined_call_operand.hbm [shape: f32[16,64], index: 8, kind: input, shape index: {}]   ;;  %s4364_s9 = inlined_call_operand.vmem [shape: f32[1,64], index: 9, kind: input, shape index: {}]   ;;  %s4365_s10 = inlined_call_operand.vmem [shape: f32[16,1], index: 10, kind: input, shape index: {}]   ;;  %s4366_s11 = inlined_call_operand.<no memory space> [shape: f32[1,1], index: 11, kind: input, shape index: {}]   ;;  %s4367_s12 = inlined_call_operand.vmem [shape: f32[2,1], index: 12, kind: output, shape index: {}]  }
   0x1   :  { %v17_v0 = vstv %s4366_s11 }
   0x2   :  { %18 = vst [vmem:[#allocation2] sm:$0x1] %v17_v0 }
   0x3   :  { %19 = vsyncpa [#allocation4], 0 }
   0x4   :  { %20 = vsyncpa [#allocation6], 0 }
   0x5   :  { %21 = vsyncpa [#allocation9], 0  ;;  %s3806_s23 = smov [#allocation5]   ;;  %s3712_s27 = scalar_lea.hbm %s4359_s4, 512 }
   0x6   :  { %s43_s24 = sshll.u32 %s3806_s23, 4  ;;  %p3713_p0 = scmp.ne.s32.totalorder %s4359_s4, %s3712_s27  ;;  %s44_s24 = int_to_ptr.vmem [resolvable:$true] %s43_s24 }
   0x7   :  { %p3716_p1 = scmp.lt.u32.totalorder %s3712_s27, %s4359_s4 }
   0x9   :  { %p3718_p2 = pnand %p3716_p1, %p3713_p0 }
   0xb   :  { %3721 = shalt.err (!%p3718_p2)
}
   0xc   :  { %s3722_s11 = scalar_lea.vmem %s44_s24, 512  ;;  %p3727_p4 = scmp.lt.s32.totalorder %s44_s24, %s44_s24 }
   0xd   :  { %p3723_p3 = scmp.ne.s32.totalorder %s44_s24, %s3722_s11  ;;  %p3728_p5 = scmp.lt.s32.totalorder %s3722_s11, %s3722_s11 }
   0xf   :  { %p3729_p6 = por %p3728_p5, %p3727_p4 }
  0x11   :  { %p3730_p7 = pnand %p3729_p6, %p3723_p3 }
  0x13   :  { %3733 = shalt.err (!%p3730_p7)
}
  0x14   :  { %s3807_s14 = smov 128   ;;  %s3808_s15 = smov 8  }
  0x15   :  { %49 = dma.hbm_to_vmem [thread:$0]  %s4359_s4, 512, %s44_s24, [#allocation6], %s3807_s14, %s3807_s14, %s3808_s15  }
  0x16   :  { %s3809_s18 = smov [#allocation3]   ;;  %s3810_s20 = smov [#allocation7]  }
  0x17   :  { %s30_s19 = sshll.u32 %s3809_s18, 4  ;;  %s59_s21 = sshll.u32 %s3810_s20, 4  ;;  %s31_s19 = int_to_ptr.vmem [resolvable:$true] %s30_s19  ;;  %s60_s21 = int_to_ptr.vmem [resolvable:$true] %s59_s21 }
  0x18   :  { %s3734_s25 = scalar_lea.hbm %s4356_s1, 64 }
  0x19   :  { %p3735_p8 = scmp.ne.s32.totalorder %s4356_s1, %s3734_s25  ;;  %p3738_p9 = scmp.lt.u32.totalorder %s3734_s25, %s4356_s1 }
  0x1b   :  { %p3740_p10 = pnand %p3738_p9, %p3735_p8 }
  0x1d   :  { %3743 = shalt.err (!%p3740_p10)
}
  0x1e   :  { %s3744_s4 = scalar_lea.vmem %s31_s19, 64  ;;  %p3749_p12 = scmp.lt.s32.totalorder %s31_s19, %s31_s19 }
  0x1f   :  { %p3745_p11 = scmp.ne.s32.totalorder %s31_s19, %s3744_s4  ;;  %p3750_p13 = scmp.lt.s32.totalorder %s3744_s4, %s3744_s4 }
  0x21   :  { %p3751_p0 = por %p3750_p13, %p3749_p12 }
  0x23   :  { %p3752_p1 = pnand %p3751_p0, %p3745_p11 }
  0x25   :  { %3755 = shalt.err (!%p3752_p1)
}
  0x26   :  { %33 = dma.hbm_to_vmem [thread:$0]  %s4356_s1, 64, %s31_s19, [#allocation4]  }
  0x27   :  { %s3756_s16 = scalar_lea.hbm %s4362_s7, 384 }
  0x28   :  { %p3757_p2 = scmp.ne.s32.totalorder %s4362_s7, %s3756_s16  ;;  %p3760_p3 = scmp.lt.u32.totalorder %s3756_s16, %s4362_s7 }
  0x2a   :  { %p3762_p4 = pnand %p3760_p3, %p3757_p2 }
  0x2c   :  { %3765 = shalt.err (!%p3762_p4)
}
  0x2d   :  { %s3766_s23 = scalar_lea.vmem %s60_s21, 384  ;;  %p3771_p6 = scmp.lt.s32.totalorder %s60_s21, %s60_s21 }
  0x2e   :  { %p3767_p5 = scmp.ne.s32.totalorder %s60_s21, %s3766_s23  ;;  %p3772_p7 = scmp.lt.s32.totalorder %s3766_s23, %s3766_s23 }
  0x30   :  { %p3773_p8 = por %p3772_p7, %p3771_p6 }
  0x32   :  { %p3774_p9 = pnand %p3773_p8, %p3767_p5 }
  0x34   :  { %3777 = shalt.err (!%p3774_p9)
}
  0x35   :  { %65 = dma.hbm_to_vmem [thread:$0]  %s4362_s7, 384, %s60_s21, [#allocation6], %s3807_s14, %s3807_s14, %s3808_s15  }
  0x36   :  { %s3811_s25 = smov [#allocation8]   ;;  %s3778_s29 = scalar_lea.hbm %s4363_s8, 256 }
  0x37   :  { %s71_s26 = sshll.u32 %s3811_s25, 4  ;;  %p3779_p10 = scmp.ne.s32.totalorder %s4363_s8, %s3778_s29  ;;  %s72_s26 = int_to_ptr.vmem [resolvable:$true] %s71_s26 }
  0x38   :  { %p3782_p11 = scmp.lt.u32.totalorder %s3778_s29, %s4363_s8 }
  0x3a   :  { %p3784_p12 = pnand %p3782_p11, %p3779_p10 }
  0x3c   :  { %3787 = shalt.err (!%p3784_p12)
}
  0x3d   :  { %s3788_s11 = scalar_lea.vmem %s72_s26, 256  ;;  %p3793_p0 = scmp.lt.s32.totalorder %s72_s26, %s72_s26 }
  0x3e   :  { %p3789_p13 = scmp.ne.s32.totalorder %s72_s26, %s3788_s11  ;;  %p3794_p1 = scmp.lt.s32.totalorder %s3788_s11, %s3788_s11 }
  0x40   :  { %p3795_p2 = por %p3794_p1, %p3793_p0 }
  0x42   :  { %p3796_p3 = pnand %p3795_p2, %p3789_p13 }
  0x44   :  { %3799 = shalt.err (!%p3796_p3)
}
  0x45   :  { %77 = dma.hbm_to_vmem [thread:$0]  %s4363_s8, 256, %s72_s26, [#allocation9], %s3807_s14, %s3807_s14, %s3808_s15  }
  0x46   :  { %3800 = dma.done.wait [#allocation4], 64  }
  0x47   :  { %3801 = vsyncadd [#allocation4], 4294967232 }
  0x48   :  { %3802 = dma.done.wait [#allocation6], 896  }
  0x49   :  { %3803 = vsyncadd [#allocation6], 4294966400 }
  0x4a   :  { %3804 = dma.done.wait [#allocation9], 256  }
  0x4b   :  { %3805 = vsyncadd [#allocation9], 4294967040  ;;  %v3812_v1 = vmov 0.0|0.0   ;;  %vm3813_vm0 = vmmov 0   ;;  %v3814_v2 = vmov 0.0   ;;  %vm113_vm1 = vcmask 1043456  }
  0x4c   :  { %3413 = vmatprep.subr.bf16.mxu1 %v3812_v1  ;;  %3127 = vmatprep.mubr.msk.f32.mxu1 %vm3813_vm0, %v3814_v2  ;;  %vm106_vm2 = vcmask 31744   ;;  %v192_v3 = vld [vmem:[%s4357_s2] sm:$0xff]  ;;  %v193_v4 = vld [vmem:[%s4357_s2 + $0x8] sm:$0xff]  ;;  %v194_v9 = vld [vmem:[%s4357_s2 + $0x10] sm:$0xff]  ;;  %s3815_s26 = smov 64   ;;  %vm204_vm3 = vcmask 261120  }
  0x4d   :  { %v98_v5 = vld [vmem:[#allocation3] sm:$0xf]  ;;  %v3957_v6 = vpack.c.bf16 %v193_v4, %v192_v3  ;;  %v97_v8 = vld [vmem:[%s4355_s0 + $0x8] sm:$0xff]  ;;  %v195_v10 = vld [vmem:[%s4357_s2 + $0x18] sm:$0xff]  ;;  %s3817_s11 = smov 80   ;;  %s3819_s7 = smov 48  }
  0x4e   :  { %3114 = vmatprep.subr.msk.mxu0 %vm113_vm1, %v98_v5  ;;  %v96_v7 = vld [vmem:[%s4355_s0] sm:$0xff]  ;;  %v3972_v11 = vpack.c.bf16 %v195_v10, %v194_v9  ;;  %v201_v31 = vld [vmem:[%s4360_s5 + $0x8] sm:$0xff]  ;;  %v4013_v35 = vld [vmem:[%s4360_s5 + $0x10] sm:$0xff]  ;;  %s3820_s21 = smov 56   ;;  %vm303_vm4 = vcmask 195584   ;;  %s3821_s8 = smov 96  }
  0x4f   :  { %3115 = vmatpush3.msk.msra.mxu0 %vm113_vm1, %v98_v5  ;;  %3116 = vmatprep.mubr.msk.f32.mxu0 %vm106_vm2, %v96_v7  ;;  %v2929_v12 = vld [vmem:[%s4358_s3] ss:$0 sm:$0xff]  ;;  %s3816_s3 = smov 32   ;;  %v196_v33 = vld [vmem:[#allocation5] sm:$0xff]  ;;  %v197_v34 = vld [vmem:[#allocation5 + $0x8] sm:$0xff]  ;;  %s3822_s14 = smov 16  }
  0x50   :  { %3415 = vmatpush3.bf16.msra.mxu1 %v3957_v6  ;;  %3117 = vmatmul.mubr.msk.f32.vlgmr.msra.gmra.mrb[0].mxu0 %vm106_vm2, %v97_v8  ;;  %v200_v30 = vld [vmem:[%s4360_s5] sm:$0xff]  ;;  %v4015_v36 = vpack.c.bf16 %v197_v34, %v196_v33  ;;  %v198_v37 = vld [vmem:[#allocation5 + $0x10] sm:$0xff]  ;;  %vm2426_vm5 = vcmask 130048   ;;  %vm2674_vm6 = vcmask 0  }
  0x51   :  { %3416 = vmatprep.subr.bf16.mxu1 %v3812_v1  ;;  %3419 = vmatprep.subr.bf16.mxu0 %v3812_v1  ;;  %v4006_v32 = vpack.c.bf16 %v201_v31, %v200_v30  ;;  %v199_v38 = vld [vmem:[#allocation5 + $0x18] sm:$0xff] }
  0x52   :  { %3136 = vmatprep.mubr.msk.f32.mxu0 %vm3813_vm0, %v3814_v2  ;;  %v4021_v39 = vpack.c.bf16 %v199_v38, %v198_v37  ;;  %v4047_v46 = vld [vmem:[%s4361_s6] ss:$0 sm:$0xff]  ;;  %s3818_s6 = smov 24  }
  0x53   :  { %3421 = vmatpush3.bf16.msra.mxu0 %v4006_v32 }
  0x54   :  { %3418 = vmatpush3.bf16.msra.mxu1 %v3972_v11  ;;  %3134 = vmatprep.subr.mxu0 %v3814_v2 }
  0x55   :  { %3428 = vmatprep.subr.bf16.mxu1 %v3812_v1 }
  0x57   :  { %3128 = vmatmul.mubr.f32.vlgmr.msra.gmra.mrb[0].mxu1 %v3814_v2  ;;  %3135 = vmatpush3.msra.mxu0 %v4013_v35 }
  0x58   :  { %3430 = vmatpush3.bf16.msra.mxu1 %v3957_v6  ;;  %3158 = vmatprep.mubr.msk.f32.mxu1 %vm3813_vm0, %v3814_v2 }
  0x59   :  { %3431 = vmatprep.subr.bf16.mxu1 %v3812_v1  ;;  %3137 = vmatmul.mubr.f32.vlgmr.msra.gmra.mrb[2].mxu0 %v3814_v2 }
  0x5a   :  { %3422 = vmatprep.subr.bf16.mxu0 %v3812_v1  ;;  %3147 = vmatprep.mubr.msk.f32.mxu0 %vm3813_vm0, %v3814_v2 }
  0x5b   :  { %3424 = vmatpush3.bf16.msra.mxu0 %v4015_v36 }
  0x5c   :  { %3433 = vmatpush3.bf16.msra.mxu1 %v3972_v11  ;;  %3425 = vmatprep.subr.bf16.mxu0 %v3812_v1 }
  0x5d   :  { %3437 = vmatprep.subr.bf16.mxu1 %v3812_v1 }
  0x5f   :  { %3427 = vmatpush3.bf16.msra.mxu0 %v4021_v39 }
  0x60   :  { %3434 = vmatprep.subr.bf16.mxu0 %v3812_v1 }
 0x123   :  { %v3118_v13 = vpop.f32.mrb[0].mxu0 }
 0x124   :  { %v3990_v14 = vadd.f32 %v3118_v13, %v2929_v12  ;;  %v183_v15 = vpop.f32.mrb[1].mxu0 }
 0x125   :  { %v3992_v16 = vadd.f32 %v2929_v12, %v183_v15 }
 0x12a   :  { %v274_v17 = vpop.f32.mrb[0].mxu1 }
 0x12b   :  { %v278_v18 = vadd.f32 %v274_v17, %v3992_v16  ;;  %v3129_v19 = vpop.f32.mrb[1].mxu1 }
 0x12c   :  { %v372_v43 = vpop.f32.mrb[2].mxu0 }
 0x12d   :  { %3568 = vtanh.f32 %v278_v18  ;;  %v2933_v21 = vmul.f32 -1.442695, %v278_v18  ;;  %v3138_v44 = vpop.f32.mrb[3].mxu0 }
 0x12f   :  { %3570 = vpow2.f32 %v2933_v21 }
 0x137   :  { %v3569_v20 = vpop.eup %3568 }
 0x138   :  { %288 = vrot.lane.b32.xlu0 %v3569_v20, %s3815_s26 }
 0x139   :  { %v3571_v22 = vpop.eup %3570 }
 0x13a   :  { %v282_v23 = vadd.f32 1.0, %v3571_v22 }
 0x13c   :  { %3572 = vrcp.f32 %v282_v23 }
 0x146   :  { %v3573_v24 = vpop.eup %3572 }
 0x147   :  { %v286_v27 = vmul.f32 0.0, %v3573_v24 }
 0x1aa   :  { %v289_v25 = vpop.permute.xlu0 %288 }
 0x1ab   :  { %v291_v26 = vmul.f32 %v3573_v24, %v289_v25 }
 0x1ad   :  { %293 = vrot.lane.b32.xlu0 %v291_v26, %s3816_s3 }
 0x21f   :  { %v294_v28 = vpop.permute.xlu0 %293 }
 0x220   :  { %v3997_v29 = vadd.f32 %v294_v28, %v286_v27 }
 0x222   :  { %3574 = vtanh.f32 %v3997_v29  ;;  %v564_v8 = vrot.slane %v3997_v29, 6 }
 0x22c   :  { %v3575_v40 = vpop.eup %3574 }
 0x22d   :  { %299 = vrot.lane.b32.xlu1 %v3575_v40, %s3815_s26 }
 0x29f   :  { %v300_v41 = vpop.permute.xlu1 %299 }
 0x2a0   :  { %v302_v42 = vmul.f32 %v3573_v24, %v300_v41 }
 0x2a2   :  { %377 = vrot.lane.b32.xlu1 %v302_v42, %s3816_s3 }
 0x314   :  { %v378_v45 = vpop.permute.xlu1 %377 }
 0x315   :  { %3148 = vmatmul.mubr.msk.f32.vlgmr.msra.gmra.mrb[4].mxu0 %vm204_vm3, %v378_v45  ;;  %3159 = vmatmul.mubr.msk.f32.vlgmr.msra.gmra.mrb[2].mxu1 %vm204_vm3, %v378_v45 }
 0x316   :  { %3436 = vmatpush3.bf16.msra.mxu0 %v4006_v32  ;;  %3439 = vmatpush3.bf16.msra.mxu1 %v4015_v36 }
 0x317   :  { %3165 = vmatprep.subr.mxu0 %v3814_v2  ;;  %3440 = vmatprep.subr.bf16.mxu1 %v3812_v1 }
 0x318   :  { %3167 = vmatprep.mubr.msk.f32.mxu0 %vm3813_vm0, %v3814_v2  ;;  %3178 = vmatprep.mubr.msk.f32.mxu1 %vm3813_vm0, %v3814_v2 }
 0x31a   :  { %3166 = vmatpush3.msra.mxu0 %v4013_v35  ;;  %3442 = vmatpush3.bf16.msra.mxu1 %v4021_v39 }
 0x31b   :  { %3443 = vmatprep.subr.bf16.mxu0 %v3812_v1  ;;  %3449 = vmatprep.subr.bf16.mxu1 %v3812_v1 }
 0x3e8   :  { %v447_v47 = vpop.f32.mrb[4].mxu0  ;;  %v548_v48 = vpop.f32.mrb[2].mxu1 }
 0x3e9   :  { %v448_v49 = vadd.f32 %v447_v47, %v372_v43  ;;  %v553_v50 = vrot.slane %v548_v48, 6  ;;  %v3149_v51 = vpop.f32.mrb[5].mxu0  ;;  %v3160_v52 = vpop.f32.mrb[3].mxu1 }
 0x3eb   :  { %v457_v53 = vadd.f32 %v4047_v46, %v448_v49  ;;  %v555_v54 = vadd.f32 %v553_v50, %v3992_v16 }
 0x3ed   :  { %3576 = vtanh.f32 %v457_v53  ;;  %v2936_v57 = vmul.f32 -1.442695, %v457_v53  ;;  %v2938_v58 = vmul.f32 -1.442695, %v555_v54 }
 0x3ee   :  { %3578 = vtanh.f32 %v555_v54 }
 0x3ef   :  { %3580 = vpow2.f32 %v2936_v57 }
 0x3f0   :  { %3582 = vpow2.f32 %v2938_v58 }
 0x3f7   :  { %v3577_v55 = vpop.eup %3576 }
 0x3f8   :  { %v3579_v56 = vpop.eup %3578  ;;  %467 = vrot.lane.b32.xlu0 %v3577_v55, %s3817_s11 }
 0x3f9   :  { %568 = vrot.lane.b32.xlu1 %v3579_v56, %s3815_s26  ;;  %v3581_v59 = vpop.eup %3580 }
 0x3fa   :  { %v3583_v60 = vpop.eup %3582  ;;  %v461_v61 = vadd.f32 1.0, %v3581_v59 }
 0x3fb   :  { %v559_v62 = vadd.f32 1.0, %v3583_v60 }
 0x3fc   :  { %3584 = vrcp.f32 %v461_v61 }
 0x3fd   :  { %3586 = vrcp.f32 %v559_v62 }
 0x406   :  { %v3585_v63 = vpop.eup %3584 }
 0x407   :  { %v3587_v3 = vpop.eup %3586  ;;  %v465_v9 = vmul.f32 0.0, %v3585_v63 }
 0x408   :  { %v566_v10 = vmul.f32 %v3587_v3, %v564_v8 }
 0x46a   :  { %v468_v0 = vpop.permute.xlu0 %467 }
 0x46b   :  { %v569_v4 = vpop.permute.xlu1 %568  ;;  %v470_v5 = vmul.f32 %v3585_v63, %v468_v0 }
 0x46c   :  { %v571_v7 = vmul.f32 %v3587_v3, %v569_v4 }
 0x46d   :  { %472 = vrot.lane.b32.xlu0 %v470_v5, %s3818_s6 }
 0x46e   :  { %573 = vrot.lane.b32.xlu1 %v571_v7, %s3816_s3 }
 0x4df   :  { %v473_v12 = vpop.permute.xlu0 %472 }
 0x4e0   :  { %v574_v13 = vpop.permute.xlu1 %573  ;;  %v4056_v15 = vadd.f32 %v473_v12, %v465_v9 }
 0x4e1   :  { %v4058_v17 = vadd.f32 %v574_v13, %v566_v10 }
 0x4e2   :  { %3588 = vtanh.f32 %v4056_v15 }
 0x4e3   :  { %3590 = vtanh.f32 %v4058_v17  ;;  %v841_v59 = vrot.slane %v4058_v17, 6 }
 0x4ec   :  { %v3589_v18 = vpop.eup %3588 }
 0x4ed   :  { %v3591_v19 = vpop.eup %3590  ;;  %478 = vrot.lane.b32.xlu0 %v3589_v18, %s3819_s7 }
 0x4ee   :  { %579 = vrot.lane.b32.xlu1 %v3591_v19, %s3815_s26 }
 0x55f   :  { %v479_v20 = vpop.permute.xlu0 %478 }
 0x560   :  { %v580_v21 = vpop.permute.xlu1 %579  ;;  %v481_v22 = vmul.f32 %v3585_v63, %v479_v20 }
 0x561   :  { %v582_v23 = vmul.f32 %v3587_v3, %v580_v21 }
 0x562   :  { %584 = vrot.lane.b32.xlu0 %v481_v22, %s3820_s21 }
 0x563   :  { %v659_v24 = vrot.slane %v582_v23, 2 }
 0x565   :  { %660 = vrot.lane.b32.xlu1 %v659_v24, %s3816_s3 }
 0x5d4   :  { %v585_v25 = vpop.permute.xlu0 %584 }
 0x5d5   :  { %3168 = vmatmul.mubr.msk.f32.vlgmr.msra.gmra.mrb[6].mxu0 %vm303_vm4, %v585_v25 }
 0x5d6   :  { %3445 = vmatpush3.bf16.msra.mxu0 %v3957_v6  ;;  %3189 = vmatprep.mubr.msk.f32.mxu0 %vm3813_vm0, %v3814_v2 }
 0x5d7   :  { %v661_v26 = vpop.permute.xlu1 %660  ;;  %3446 = vmatprep.subr.bf16.mxu0 %v3812_v1 }
 0x5d8   :  { %3179 = vmatmul.mubr.msk.f32.vlgmr.msra.gmra.mrb[4].mxu1 %vm204_vm3, %v661_v26 }
 0x5d9   :  { %3451 = vmatpush3.bf16.msra.mxu1 %v4006_v32  ;;  %3198 = vmatprep.mubr.msk.f32.mxu1 %vm3813_vm0, %v3814_v2 }
 0x5da   :  { %3448 = vmatpush3.bf16.msra.mxu0 %v3972_v11  ;;  %3196 = vmatprep.subr.mxu1 %v3814_v2 }
 0x5db   :  { %3452 = vmatprep.subr.bf16.mxu0 %v3812_v1 }
 0x5dd   :  { %3190 = vmatmul.mubr.msk.f32.vlgmr.msra.gmra.mrb[8].mxu0 %vm204_vm3, %v661_v26  ;;  %3197 = vmatpush3.msra.mxu1 %v4013_v35 }
 0x5de   :  { %3458 = vmatprep.subr.bf16.mxu1 %v3812_v1  ;;  %3454 = vmatpush3.bf16.msra.mxu0 %v4015_v36 }
 0x5df   :  { %3455 = vmatprep.subr.bf16.mxu0 %v3812_v1  ;;  %3209 = vmatprep.mubr.msk.f32.mxu0 %vm3813_vm0, %v3814_v2 }
 0x5e2   :  { %3457 = vmatpush3.bf16.msra.mxu0 %v4021_v39 }
 0x5e3   :  { %3464 = vmatprep.subr.bf16.mxu0 %v3812_v1 }
 0x6a8   :  { %v654_v27 = vpop.f32.mrb[6].mxu0 }
 0x6a9   :  { %v3169_v28 = vpop.f32.mrb[7].mxu0 }
 0x6ab   :  { %v730_v29 = vpop.f32.mrb[4].mxu1 }
 0x6ac   :  { %v731_v30 = vadd.f32 %v730_v29, %v654_v27  ;;  %v3180_v31 = vpop.f32.mrb[5].mxu1 }
 0x6ae   :  { %v734_v33 = vadd.f32 %v4047_v46, %v731_v30 }
 0x6b0   :  { %3592 = vtanh.f32 %v734_v33  ;;  %v825_v34 = vpop.f32.mrb[8].mxu0  ;;  %v2941_v43 = vmul.f32 -1.442695, %v734_v33 }
 0x6b1   :  { %v830_v37 = vrot.slane %v825_v34, 4  ;;  %v3191_v38 = vpop.f32.mrb[9].mxu0 }
 0x6b3   :  { %v832_v40 = vadd.f32 %v830_v37, %v3992_v16 }
 0x6b5   :  { %3594 = vtanh.f32 %v832_v40  ;;  %v2943_v44 = vmul.f32 -1.442695, %v832_v40 }
 0x6b6   :  { %3596 = vpow2.f32 %v2941_v43 }
 0x6b7   :  { %3598 = vpow2.f32 %v2943_v44 }
 0x6ba   :  { %v3593_v41 = vpop.eup %3592 }
 0x6bb   :  { %744 = vrot.lane.b32.xlu0 %v3593_v41, %s3817_s11 }
 0x6bf   :  { %v3595_v42 = vpop.eup %3594 }
 0x6c0   :  { %845 = vrot.lane.b32.xlu1 %v3595_v42, %s3815_s26  ;;  %v3597_v45 = vpop.eup %3596 }
 0x6c1   :  { %v738_v47 = vadd.f32 1.0, %v3597_v45  ;;  %v3599_v48 = vpop.eup %3598 }
 0x6c2   :  { %v836_v49 = vadd.f32 1.0, %v3599_v48 }
 0x6c3   :  { %3600 = vrcp.f32 %v738_v47 }
 0x6c4   :  { %3602 = vrcp.f32 %v836_v49 }
 0x6cd   :  { %v3601_v50 = vpop.eup %3600 }
 0x6ce   :  { %v3603_v53 = vpop.eup %3602  ;;  %v742_v56 = vmul.f32 %v3601_v50, %v4056_v15 }
 0x6cf   :  { %v843_v60 = vmul.f32 %v3603_v53, %v841_v59 }
 0x72d   :  { %v745_v51 = vpop.permute.xlu0 %744 }
 0x72e   :  { %v747_v52 = vmul.f32 %v3601_v50, %v745_v51 }
 0x730   :  { %749 = vrot.lane.b32.xlu0 %v747_v52, %s3818_s6 }
 0x732   :  { %v846_v54 = vpop.permute.xlu1 %845 }
 0x733   :  { %v848_v55 = vmul.f32 %v3603_v53, %v846_v54 }
 0x735   :  { %850 = vrot.lane.b32.xlu1 %v848_v55, %s3816_s3 }
 0x7a2   :  { %v750_v57 = vpop.permute.xlu0 %749 }
 0x7a3   :  { %v4094_v58 = vadd.f32 %v750_v57, %v742_v56 }
 0x7a5   :  { %3604 = vtanh.f32 %v4094_v58 }
 0x7a7   :  { %v851_v61 = vpop.permute.xlu1 %850 }
 0x7a8   :  { %v4098_v62 = vadd.f32 %v851_v61, %v843_v60 }
 0x7aa   :  { %3606 = vtanh.f32 %v4098_v62  ;;  %v1118_v41 = vrot.slane %v4098_v62, 6 }
 0x7af   :  { %v3605_v63 = vpop.eup %3604 }
 0x7b0   :  { %755 = vrot.lane.b32.xlu0 %v3605_v63, %s3819_s7 }
 0x7b4   :  { %v3607_v0 = vpop.eup %3606 }
 0x7b5   :  { %856 = vrot.lane.b32.xlu1 %v3607_v0, %s3815_s26 }
 0x822   :  { %v756_v3 = vpop.permute.xlu0 %755 }
 0x823   :  { %v758_v4 = vmul.f32 %v3601_v50, %v756_v3 }
 0x825   :  { %861 = vrot.lane.b32.xlu0 %v758_v4, %s3820_s21 }
 0x827   :  { %v857_v5 = vpop.permute.xlu1 %856 }
 0x828   :  { %v859_v7 = vmul.f32 %v3603_v53, %v857_v5 }
 0x82a   :  { %v936_v8 = vrot.slane %v859_v7, 4 }
 0x82c   :  { %937 = vrot.lane.b32.xlu1 %v936_v8, %s3816_s3 }
 0x897   :  { %v862_v9 = vpop.permute.xlu0 %861 }
 0x898   :  { %3199 = vmatmul.mubr.msk.f32.vlgmr.msra.gmra.mrb[6].mxu1 %vm303_vm4, %v862_v9 }
 0x899   :  { %3460 = vmatpush3.bf16.msra.mxu1 %v3957_v6  ;;  %3220 = vmatprep.mubr.msk.f32.mxu1 %vm3813_vm0, %v3814_v2 }
 0x89a   :  { %3461 = vmatprep.subr.bf16.mxu1 %v3812_v1 }
 0x89d   :  { %3463 = vmatpush3.bf16.msra.mxu1 %v3972_v11 }
 0x89e   :  { %v938_v10 = vpop.permute.xlu1 %937  ;;  %3467 = vmatprep.subr.bf16.mxu1 %v3812_v1 }
 0x89f   :  { %3210 = vmatmul.mubr.msk.f32.vlgmr.msra.gmra.mrb[10].mxu0 %vm204_vm3, %v938_v10 }
 0x8a0   :  { %3221 = vmatmul.mubr.msk.f32.vlgmr.msra.gmra.mrb[8].mxu1 %vm204_vm3, %v938_v10  ;;  %3466 = vmatpush3.bf16.msra.mxu0 %v4006_v32 }
 0x8a1   :  { %3469 = vmatpush3.bf16.msra.mxu1 %v4015_v36  ;;  %3227 = vmatprep.subr.mxu0 %v3814_v2 }
 0x8a2   :  { %3470 = vmatprep.subr.bf16.mxu1 %v3812_v1  ;;  %3229 = vmatprep.mubr.msk.f32.mxu0 %vm3813_vm0, %v3814_v2 }
 0x8a3   :  { %3240 = vmatprep.mubr.msk.f32.mxu1 %vm3813_vm0, %v3814_v2 }
 0x8a4   :  { %3228 = vmatpush3.msra.mxu0 %v4013_v35 }
 0x8a5   :  { %3472 = vmatpush3.bf16.msra.mxu1 %v4021_v39  ;;  %3473 = vmatprep.subr.bf16.mxu0 %v3812_v1 }
 0x8a6   :  { %3479 = vmatprep.subr.bf16.mxu1 %v3812_v1 }
 0x96b   :  { %v931_v12 = vpop.f32.mrb[6].mxu1 }
 0x96c   :  { %v3200_v13 = vpop.f32.mrb[7].mxu1 }
 0x972   :  { %v1007_v15 = vpop.f32.mrb[10].mxu0 }
 0x973   :  { %v1008_v17 = vadd.f32 %v1007_v15, %v931_v12  ;;  %v1102_v18 = vpop.f32.mrb[8].mxu1  ;;  %v3211_v19 = vpop.f32.mrb[11].mxu0 }
 0x974   :  { %v1107_v20 = vrot.slane %v1102_v18, 2  ;;  %v3222_v21 = vpop.f32.mrb[9].mxu1 }
 0x975   :  { %v1011_v22 = vadd.f32 %v4047_v46, %v1008_v17 }
 0x976   :  { %v1109_v23 = vadd.f32 %v1107_v20, %v3992_v16 }
 0x977   :  { %3608 = vtanh.f32 %v1011_v22  ;;  %v2946_v26 = vmul.f32 -1.442695, %v1011_v22 }
 0x978   :  { %3610 = vtanh.f32 %v1109_v23  ;;  %v2948_v27 = vmul.f32 -1.442695, %v1109_v23 }
 0x979   :  { %3612 = vpow2.f32 %v2946_v26 }
 0x97a   :  { %3614 = vpow2.f32 %v2948_v27 }
 0x981   :  { %v3609_v24 = vpop.eup %3608 }
 0x982   :  { %v3611_v25 = vpop.eup %3610  ;;  %1021 = vrot.lane.b32.xlu1 %v3609_v24, %s3817_s11 }
 0x983   :  { %1122 = vrot.lane.b32.xlu0 %v3611_v25, %s3815_s26  ;;  %v3613_v28 = vpop.eup %3612 }
 0x984   :  { %v3615_v29 = vpop.eup %3614  ;;  %v1015_v30 = vadd.f32 1.0, %v3613_v28 }
 0x985   :  { %v1113_v31 = vadd.f32 1.0, %v3615_v29 }
 0x986   :  { %3616 = vrcp.f32 %v1015_v30 }
 0x987   :  { %3618 = vrcp.f32 %v1113_v31 }
 0x990   :  { %v3617_v33 = vpop.eup %3616 }
 0x991   :  { %v3619_v34 = vpop.eup %3618  ;;  %v1019_v42 = vmul.f32 %v3617_v33, %v4094_v58 }
 0x992   :  { %v1120_v43 = vmul.f32 %v3619_v34, %v1118_v41 }
 0x9f4   :  { %v1022_v16 = vpop.permute.xlu1 %1021 }
 0x9f5   :  { %v1123_v37 = vpop.permute.xlu0 %1122  ;;  %v1024_v38 = vmul.f32 %v3617_v33, %v1022_v16 }
 0x9f6   :  { %v1125_v40 = vmul.f32 %v3619_v34, %v1123_v37 }
 0x9f7   :  { %1026 = vrot.lane.b32.xlu1 %v1024_v38, %s3818_s6 }
 0x9f8   :  { %1127 = vrot.lane.b32.xlu0 %v1125_v40, %s3816_s3 }
 0xa69   :  { %v1027_v44 = vpop.permute.xlu1 %1026 }
 0xa6a   :  { %v1128_v45 = vpop.permute.xlu0 %1127  ;;  %v4134_v47 = vadd.f32 %v1027_v44, %v1019_v42 }
 0xa6b   :  { %v4136_v48 = vadd.f32 %v1128_v45, %v1120_v43 }
 0xa6c   :  { %3620 = vtanh.f32 %v4134_v47 }
 0xa6d   :  { %3622 = vtanh.f32 %v4136_v48  ;;  %v1392_v24 = vrot.slane %v4136_v48, 6 }
 0xa76   :  { %v3621_v49 = vpop.eup %3620 }
 0xa77   :  { %v3623_v50 = vpop.eup %3622  ;;  %1032 = vrot.lane.b32.xlu1 %v3621_v49, %s3819_s7 }
 0xa78   :  { %1133 = vrot.lane.b32.xlu0 %v3623_v50, %s3815_s26 }
 0xae9   :  { %v1033_v51 = vpop.permute.xlu1 %1032 }
 0xaea   :  { %v1134_v52 = vpop.permute.xlu0 %1133  ;;  %v1035_v53 = vmul.f32 %v3617_v33, %v1033_v51 }
 0xaeb   :  { %v1136_v54 = vmul.f32 %v3619_v34, %v1134_v52 }
 0xaec   :  { %1138 = vrot.lane.b32.xlu0 %v1035_v53, %s3820_s21 }
 0xaed   :  { %v1213_v55 = vrot.slane %v1136_v54, 6 }
 0xaef   :  { %1214 = vrot.lane.b32.xlu1 %v1213_v55, %s3816_s3 }
 0xb5e   :  { %v1139_v56 = vpop.permute.xlu0 %1138 }
 0xb5f   :  { %3230 = vmatmul.mubr.msk.f32.vlgmr.msra.gmra.mrb[12].mxu0 %vm303_vm4, %v1139_v56 }
 0xb60   :  { %3475 = vmatpush3.bf16.msra.mxu0 %v3957_v6  ;;  %3251 = vmatprep.mubr.msk.f32.mxu0 %vm3813_vm0, %v3814_v2 }
 0xb61   :  { %v1215_v57 = vpop.permute.xlu1 %1214  ;;  %3476 = vmatprep.subr.bf16.mxu0 %v3812_v1 }
 0xb62   :  { %3241 = vmatmul.mubr.msk.f32.vlgmr.msra.gmra.mrb[10].mxu1 %vm204_vm3, %v1215_v57 }
 0xb63   :  { %3481 = vmatpush3.bf16.msra.mxu1 %v4006_v32  ;;  %3260 = vmatprep.mubr.msk.f32.mxu1 %vm3813_vm0, %v3814_v2 }
 0xb64   :  { %3478 = vmatpush3.bf16.msra.mxu0 %v3972_v11  ;;  %3258 = vmatprep.subr.mxu1 %v3814_v2 }
 0xb65   :  { %3482 = vmatprep.subr.bf16.mxu0 %v3812_v1 }
 0xb67   :  { %3252 = vmatmul.mubr.msk.f32.vlgmr.msra.gmra.mrb[14].mxu0 %vm204_vm3, %v1215_v57  ;;  %3259 = vmatpush3.msra.mxu1 %v4013_v35 }
 0xb68   :  { %3484 = vmatpush3.bf16.msra.mxu0 %v4015_v36  ;;  %3488 = vmatprep.subr.bf16.mxu1 %v3812_v1 }
 0xb69   :  { %3485 = vmatprep.subr.bf16.mxu0 %v3812_v1  ;;  %3271 = vmatprep.mubr.msk.f32.mxu0 %vm3813_vm0, %v3814_v2 }
 0xb6c   :  { %3487 = vmatpush3.bf16.msra.mxu0 %v4021_v39 }
 0xb6d   :  { %3494 = vmatprep.subr.bf16.mxu0 %v3812_v1 }
 0xc32   :  { %v1208_v58 = vpop.f32.mrb[12].mxu0 }
 0xc33   :  { %v3231_v59 = vpop.f32.mrb[13].mxu0 }
 0xc35   :  { %v1284_v60 = vpop.f32.mrb[10].mxu1 }
 0xc36   :  { %v1285_v61 = vadd.f32 %v1284_v60, %v1208_v58  ;;  %v3242_v62 = vpop.f32.mrb[11].mxu1 }
 0xc38   :  { %v1288_v63 = vadd.f32 %v4047_v46, %v1285_v61 }
 0xc3a   :  { %3624 = vtanh.f32 %v1288_v63  ;;  %v1379_v0 = vpop.f32.mrb[14].mxu0  ;;  %v2951_v8 = vmul.f32 -1.442695, %v1288_v63 }
 0xc3b   :  { %v1383_v3 = vadd.f32 %v1379_v0, %v3990_v14  ;;  %v3253_v4 = vpop.f32.mrb[15].mxu0 }
 0xc3d   :  { %3626 = vtanh.f32 %v1383_v3  ;;  %v2953_v9 = vmul.f32 -1.442695, %v1383_v3 }
 0xc3e   :  { %3628 = vpow2.f32 %v2951_v8 }
 0xc3f   :  { %3630 = vpow2.f32 %v2953_v9 }
 0xc44   :  { %v3625_v5 = vpop.eup %3624 }
 0xc45   :  { %1298 = vrot.lane.b32.xlu0 %v3625_v5, %s3817_s11 }
 0xc47   :  { %v3627_v7 = vpop.eup %3626 }
 0xc48   :  { %1396 = vrot.lane.b32.xlu1 %v3627_v7, %s3815_s26  ;;  %v3629_v10 = vpop.eup %3628 }
 0xc49   :  { %v3631_v12 = vpop.eup %3630  ;;  %v1292_v13 = vadd.f32 1.0, %v3629_v10 }
 0xc4a   :  { %v1387_v15 = vadd.f32 1.0, %v3631_v12 }
 0xc4b   :  { %3632 = vrcp.f32 %v1292_v13 }
 0xc4c   :  { %3634 = vrcp.f32 %v1387_v15 }
 0xc55   :  { %v3633_v17 = vpop.eup %3632 }
 0xc56   :  { %v3635_v20 = vpop.eup %3634  ;;  %v1296_v23 = vmul.f32 %v3633_v17, %v4134_v47 }
 0xc57   :  { %v1394_v27 = vmul.f32 %v3635_v20, %v1392_v24 }
 0xcb7   :  { %v1299_v18 = vpop.permute.xlu0 %1298 }
 0xcb8   :  { %v1301_v19 = vmul.f32 %v3633_v17, %v1299_v18 }
 0xcba   :  { %1303 = vrot.lane.b32.xlu0 %v1301_v19, %s3818_s6  ;;  %v1397_v21 = vpop.permute.xlu1 %1396 }
 0xcbb   :  { %v1399_v22 = vmul.f32 %v3635_v20, %v1397_v21 }
 0xcbd   :  { %1401 = vrot.lane.b32.xlu1 %v1399_v22, %s3816_s3 }
 0xd2c   :  { %v1304_v25 = vpop.permute.xlu0 %1303 }
 0xd2d   :  { %v4173_v26 = vadd.f32 %v1304_v25, %v1296_v23 }
 0xd2f   :  { %3636 = vtanh.f32 %v4173_v26  ;;  %v1402_v28 = vpop.permute.xlu1 %1401 }
 0xd30   :  { %v4176_v29 = vadd.f32 %v1402_v28, %v1394_v27 }
 0xd32   :  { %3638 = vtanh.f32 %v4176_v29  ;;  %v1668_v8 = vrot.slane %v4176_v29, 6 }
 0xd39   :  { %v3637_v30 = vpop.eup %3636 }
 0xd3a   :  { %1309 = vrot.lane.b32.xlu0 %v3637_v30, %s3819_s7 }
 0xd3c   :  { %v3639_v31 = vpop.eup %3638 }
 0xd3d   :  { %1407 = vrot.lane.b32.xlu1 %v3639_v31, %s3815_s26 }
 0xdac   :  { %v1310_v33 = vpop.permute.xlu0 %1309 }
 0xdad   :  { %v1312_v16 = vmul.f32 %v3633_v17, %v1310_v33 }
 0xdaf   :  { %1412 = vrot.lane.b32.xlu0 %v1312_v16, %s3820_s21  ;;  %v1408_v34 = vpop.permute.xlu1 %1407 }
 0xdb0   :  { %v1410_v37 = vmul.f32 %v3635_v20, %v1408_v34 }
 0xdb2   :  { %1487 = vrot.lane.b32.xlu1 %v1410_v37, %s3816_s3 }
 0xe21   :  { %v1413_v38 = vpop.permute.xlu0 %1412 }
 0xe22   :  { %3261 = vmatmul.mubr.msk.f32.vlgmr.msra.gmra.mrb[12].mxu1 %vm303_vm4, %v1413_v38 }
 0xe23   :  { %3490 = vmatpush3.bf16.msra.mxu1 %v3957_v6  ;;  %3282 = vmatprep.mubr.msk.f32.mxu1 %vm3813_vm0, %v3814_v2 }
 0xe24   :  { %v1488_v40 = vpop.permute.xlu1 %1487  ;;  %3491 = vmatprep.subr.bf16.mxu1 %v3812_v1 }
 0xe25   :  { %3272 = vmatmul.mubr.msk.f32.vlgmr.msra.gmra.mrb[16].mxu0 %vm204_vm3, %v1488_v40 }
 0xe26   :  { %3496 = vmatpush3.bf16.msra.mxu0 %v4006_v32  ;;  %3291 = vmatprep.mubr.msk.f32.mxu0 %vm3813_vm0, %v3814_v2 }
 0xe27   :  { %3493 = vmatpush3.bf16.msra.mxu1 %v3972_v11  ;;  %3289 = vmatprep.subr.mxu0 %v3814_v2 }
 0xe28   :  { %3497 = vmatprep.subr.bf16.mxu1 %v3812_v1 }
 0xe2a   :  { %3283 = vmatmul.mubr.msk.f32.vlgmr.msra.gmra.mrb[14].mxu1 %vm204_vm3, %v1488_v40  ;;  %3290 = vmatpush3.msra.mxu0 %v4013_v35 }
 0xe2b   :  { %3499 = vmatpush3.bf16.msra.mxu1 %v4015_v36  ;;  %3503 = vmatprep.subr.bf16.mxu0 %v3812_v1 }
 0xe2c   :  { %3500 = vmatprep.subr.bf16.mxu1 %v3812_v1  ;;  %3302 = vmatprep.mubr.msk.f32.mxu1 %vm3813_vm0, %v3814_v2 }
 0xe2f   :  { %3502 = vmatpush3.bf16.msra.mxu1 %v4021_v39 }
 0xe30   :  { %3509 = vmatprep.subr.bf16.mxu1 %v3812_v1 }
 0xef5   :  { %v1482_v41 = vpop.f32.mrb[12].mxu1 }
 0xef6   :  { %v3262_v42 = vpop.f32.mrb[13].mxu1 }
 0xef8   :  { %v1557_v43 = vpop.f32.mrb[16].mxu0 }
 0xef9   :  { %v1558_v44 = vadd.f32 %v1557_v43, %v1482_v41  ;;  %v3273_v45 = vpop.f32.mrb[17].mxu0 }
 0xefb   :  { %v1561_v47 = vadd.f32 %v4047_v46, %v1558_v44 }
 0xefd   :  { %3640 = vtanh.f32 %v1561_v47  ;;  %v1652_v48 = vpop.f32.mrb[14].mxu1  ;;  %v2956_v54 = vmul.f32 -1.442695, %v1561_v47 }
 0xefe   :  { %v1657_v49 = vrot.slane %v1652_v48, 6  ;;  %v3284_v50 = vpop.f32.mrb[15].mxu1 }
 0xf00   :  { %v1659_v51 = vadd.f32 %v1657_v49, %v3990_v14 }
 0xf02   :  { %3642 = vtanh.f32 %v1659_v51  ;;  %v2958_v55 = vmul.f32 -1.442695, %v1659_v51 }
 0xf03   :  { %3644 = vpow2.f32 %v2956_v54 }
 0xf04   :  { %3646 = vpow2.f32 %v2958_v55 }
 0xf07   :  { %v3641_v52 = vpop.eup %3640 }
 0xf08   :  { %1571 = vrot.lane.b32.xlu0 %v3641_v52, %s3817_s11 }
 0xf0c   :  { %v3643_v53 = vpop.eup %3642 }
 0xf0d   :  { %1672 = vrot.lane.b32.xlu1 %v3643_v53, %s3815_s26  ;;  %v3645_v56 = vpop.eup %3644 }
 0xf0e   :  { %v1565_v57 = vadd.f32 1.0, %v3645_v56  ;;  %v3647_v58 = vpop.eup %3646 }
 0xf0f   :  { %v1663_v59 = vadd.f32 1.0, %v3647_v58 }
 0xf10   :  { %3648 = vrcp.f32 %v1565_v57 }
 0xf11   :  { %3650 = vrcp.f32 %v1663_v59 }
 0xf1a   :  { %v3649_v60 = vpop.eup %3648 }
 0xf1b   :  { %v3651_v63 = vpop.eup %3650  ;;  %v1569_v4 = vmul.f32 %v3649_v60, %v4173_v26 }
 0xf1c   :  { %v1670_v9 = vmul.f32 %v3651_v63, %v1668_v8 }
 0xf7a   :  { %v1572_v61 = vpop.permute.xlu0 %1571 }
 0xf7b   :  { %v1574_v62 = vmul.f32 %v3649_v60, %v1572_v61 }
 0xf7d   :  { %1576 = vrot.lane.b32.xlu0 %v1574_v62, %s3818_s6 }
 0xf7f   :  { %v1673_v0 = vpop.permute.xlu1 %1672 }
 0xf80   :  { %v1675_v3 = vmul.f32 %v3651_v63, %v1673_v0 }
 0xf82   :  { %1677 = vrot.lane.b32.xlu1 %v1675_v3, %s3816_s3 }
 0xfef   :  { %v1577_v5 = vpop.permute.xlu0 %1576 }
 0xff0   :  { %v4211_v7 = vadd.f32 %v1577_v5, %v1569_v4 }
 0xff2   :  { %3652 = vtanh.f32 %v4211_v7 }
 0xff4   :  { %v1678_v10 = vpop.permute.xlu1 %1677 }
 0xff5   :  { %v4215_v12 = vadd.f32 %v1678_v10, %v1670_v9 }
 0xff7   :  { %3654 = vtanh.f32 %v4215_v12  ;;  %v1945_v52 = vrot.slane %v4215_v12, 6 }
 0xffc   :  { %v3653_v13 = vpop.eup %3652 }
 0xffd   :  { %1582 = vrot.lane.b32.xlu0 %v3653_v13, %s3819_s7 }
0x1001   :  { %v3655_v15 = vpop.eup %3654 }
0x1002   :  { %1683 = vrot.lane.b32.xlu1 %v3655_v15, %s3815_s26 }
0x106f   :  { %v1583_v17 = vpop.permute.xlu0 %1582 }
0x1070   :  { %v1585_v18 = vmul.f32 %v3649_v60, %v1583_v17 }
0x1072   :  { %1688 = vrot.lane.b32.xlu0 %v1585_v18, %s3820_s21 }
0x1074   :  { %v1684_v19 = vpop.permute.xlu1 %1683 }
0x1075   :  { %v1686_v20 = vmul.f32 %v3651_v63, %v1684_v19 }
0x1077   :  { %v1763_v21 = vrot.slane %v1686_v20, 2 }
0x1079   :  { %1764 = vrot.lane.b32.xlu1 %v1763_v21, %s3816_s3 }
0x10e4   :  { %v1689_v22 = vpop.permute.xlu0 %1688 }
0x10e5   :  { %3292 = vmatmul.mubr.msk.f32.vlgmr.msra.gmra.mrb[18].mxu0 %vm303_vm4, %v1689_v22 }
0x10e6   :  { %3505 = vmatpush3.bf16.msra.mxu0 %v3957_v6  ;;  %3313 = vmatprep.mubr.msk.f32.mxu0 %vm3813_vm0, %v3814_v2 }
0x10e7   :  { %3506 = vmatprep.subr.bf16.mxu0 %v3812_v1 }
0x10ea   :  { %3508 = vmatpush3.bf16.msra.mxu0 %v3972_v11 }
0x10eb   :  { %v1765_v23 = vpop.permute.xlu1 %1764  ;;  %3512 = vmatprep.subr.bf16.mxu0 %v3812_v1 }
0x10ec   :  { %3303 = vmatmul.mubr.msk.f32.vlgmr.msra.gmra.mrb[16].mxu1 %vm204_vm3, %v1765_v23 }
0x10ed   :  { %3314 = vmatmul.mubr.msk.f32.vlgmr.msra.gmra.mrb[20].mxu0 %vm204_vm3, %v1765_v23  ;;  %3511 = vmatpush3.bf16.msra.mxu1 %v4006_v32 }
0x10ee   :  { %3514 = vmatpush3.bf16.msra.mxu0 %v4015_v36  ;;  %3320 = vmatprep.subr.mxu1 %v3814_v2 }
0x10ef   :  { %3322 = vmatprep.mubr.msk.f32.mxu1 %vm3813_vm0, %v3814_v2  ;;  %3515 = vmatprep.subr.bf16.mxu0 %v3812_v1 }
0x10f0   :  { %3333 = vmatprep.mubr.msk.f32.mxu0 %vm3813_vm0, %v3814_v2 }
0x10f1   :  { %3321 = vmatpush3.msra.mxu1 %v4013_v35 }
0x10f2   :  { %3518 = vmatprep.subr.bf16.mxu1 %v3812_v1  ;;  %3517 = vmatpush3.bf16.msra.mxu0 %v4021_v39 }
0x10f3   :  { %3524 = vmatprep.subr.bf16.mxu0 %v3812_v1 }
0x11b8   :  { %v1758_v24 = vpop.f32.mrb[18].mxu0 }
0x11b9   :  { %v3293_v25 = vpop.f32.mrb[19].mxu0 }
0x11bf   :  { %v1834_v26 = vpop.f32.mrb[16].mxu1 }
0x11c0   :  { %v1835_v27 = vadd.f32 %v1834_v26, %v1758_v24  ;;  %v3304_v28 = vpop.f32.mrb[17].mxu1  ;;  %v1929_v29 = vpop.f32.mrb[20].mxu0 }
0x11c1   :  { %v1934_v30 = vrot.slane %v1929_v29, 4  ;;  %v3315_v31 = vpop.f32.mrb[21].mxu0 }
0x11c2   :  { %v1838_v33 = vadd.f32 %v4047_v46, %v1835_v27 }
0x11c3   :  { %v1936_v16 = vadd.f32 %v1934_v30, %v3990_v14 }
0x11c4   :  { %3656 = vtanh.f32 %v1838_v33  ;;  %v2961_v38 = vmul.f32 -1.442695, %v1838_v33 }
0x11c5   :  { %3658 = vtanh.f32 %v1936_v16  ;;  %v2963_v40 = vmul.f32 -1.442695, %v1936_v16 }
0x11c6   :  { %3660 = vpow2.f32 %v2961_v38 }
0x11c7   :  { %3662 = vpow2.f32 %v2963_v40 }
0x11ce   :  { %v3657_v34 = vpop.eup %3656 }
0x11cf   :  { %v3659_v37 = vpop.eup %3658  ;;  %1848 = vrot.lane.b32.xlu0 %v3657_v34, %s3817_s11 }
0x11d0   :  { %1949 = vrot.lane.b32.xlu1 %v3659_v37, %s3815_s26  ;;  %v3661_v41 = vpop.eup %3660 }
0x11d1   :  { %v3663_v42 = vpop.eup %3662  ;;  %v1842_v43 = vadd.f32 1.0, %v3661_v41 }
0x11d2   :  { %v1940_v44 = vadd.f32 1.0, %v3663_v42 }
0x11d3   :  { %3664 = vrcp.f32 %v1842_v43 }
0x11d4   :  { %3666 = vrcp.f32 %v1940_v44 }
0x11dd   :  { %v3665_v45 = vpop.eup %3664 }
0x11de   :  { %v3667_v48 = vpop.eup %3666  ;;  %v1846_v53 = vmul.f32 %v3665_v45, %v4211_v7 }
0x11df   :  { %v1947_v55 = vmul.f32 %v3667_v48, %v1945_v52 }
0x1241   :  { %v1849_v47 = vpop.permute.xlu0 %1848 }
0x1242   :  { %v1851_v49 = vmul.f32 %v3665_v45, %v1849_v47  ;;  %v1950_v50 = vpop.permute.xlu1 %1949 }
0x1243   :  { %v1952_v51 = vmul.f32 %v3667_v48, %v1950_v50 }
0x1244   :  { %1853 = vrot.lane.b32.xlu0 %v1851_v49, %s3818_s6 }
0x1245   :  { %1954 = vrot.lane.b32.xlu1 %v1952_v51, %s3816_s3 }
0x12b6   :  { %v1854_v54 = vpop.permute.xlu0 %1853 }
0x12b7   :  { %v4251_v56 = vadd.f32 %v1854_v54, %v1846_v53  ;;  %v1955_v57 = vpop.permute.xlu1 %1954 }
0x12b8   :  { %v4253_v58 = vadd.f32 %v1955_v57, %v1947_v55 }
0x12b9   :  { %3668 = vtanh.f32 %v4251_v56 }
0x12ba   :  { %3670 = vtanh.f32 %v4253_v58  ;;  %v2222_v30 = vrot.slane %v4253_v58, 6 }
0x12c3   :  { %v3669_v59 = vpop.eup %3668 }
0x12c4   :  { %v3671_v60 = vpop.eup %3670  ;;  %1859 = vrot.lane.b32.xlu0 %v3669_v59, %s3819_s7 }
0x12c5   :  { %1960 = vrot.lane.b32.xlu1 %v3671_v60, %s3815_s26 }
0x1336   :  { %v1860_v61 = vpop.permute.xlu0 %1859 }
0x1337   :  { %v1862_v62 = vmul.f32 %v3665_v45, %v1860_v61  ;;  %v1961_v63 = vpop.permute.xlu1 %1960 }
0x1338   :  { %v1963_v0 = vmul.f32 %v3667_v48, %v1961_v63  ;;  %v2417_v63 = vld [vmem:[#allocation7] sm:$0xff] }
0x1339   :  { %1965 = vrot.lane.b32.xlu0 %v1862_v62, %s3820_s21 }
0x133a   :  { %v2040_v3 = vrot.slane %v1963_v0, 4  ;;  %v2420_v0 = vld [vmem:[#allocation8] sm:$0xff] }
0x133c   :  { %2041 = vrot.lane.b32.xlu1 %v2040_v3, %s3816_s3 }
0x13ab   :  { %v1966_v4 = vpop.permute.xlu0 %1965 }
0x13ac   :  { %3323 = vmatmul.mubr.msk.f32.vlgmr.msra.gmra.mrb[18].mxu1 %vm303_vm4, %v1966_v4  ;;  %v2421_v4 = vld [vmem:[#allocation8 + $0x8] sm:$0xff] }
0x13ad   :  { %3520 = vmatpush3.bf16.msra.mxu1 %v3957_v6  ;;  %3344 = vmatprep.mubr.msk.f32.mxu1 %vm3813_vm0, %v3814_v2 }
0x13ae   :  { %v2042_v5 = vpop.permute.xlu1 %2041  ;;  %3521 = vmatprep.subr.bf16.mxu1 %v3812_v1 }
0x13af   :  { %3334 = vmatmul.mubr.msk.f32.vlgmr.msra.gmra.mrb[22].mxu0 %vm204_vm3, %v2042_v5 }
0x13b0   :  { %3526 = vmatpush3.bf16.msra.mxu0 %v4006_v32  ;;  %3353 = vmatprep.mubr.msk.f32.mxu0 %vm3813_vm0, %v3814_v2 }
0x13b1   :  { %3523 = vmatpush3.bf16.msra.mxu1 %v3972_v11  ;;  %3351 = vmatprep.subr.mxu0 %v3814_v2 }
0x13b2   :  { %3527 = vmatprep.subr.bf16.mxu1 %v3812_v1 }
0x13b4   :  { %3345 = vmatmul.mubr.msk.f32.vlgmr.msra.gmra.mrb[20].mxu1 %vm204_vm3, %v2042_v5  ;;  %3352 = vmatpush3.msra.mxu0 %v4013_v35  ;;  %v4303_v5 = vpack.c.bf16 %v2421_v4, %v2420_v0 }
0x13b5   :  { %3529 = vmatpush3.bf16.msra.mxu1 %v4015_v36  ;;  %3364 = vmatprep.mubr.msk.f32.mxu1 %vm3813_vm0, %v3814_v2 }
0x13b6   :  { %3530 = vmatprep.subr.bf16.mxu1 %v3812_v1  ;;  %3533 = vmatprep.subr.bf16.mxu0 %v3812_v1 }
0x13b9   :  { %3532 = vmatpush3.bf16.msra.mxu1 %v4021_v39 }
0x13ba   :  { %3536 = vmatprep.subr.bf16.mxu1 %v3812_v1 }
0x147f   :  { %v2035_v6 = vpop.f32.mrb[18].mxu1 }
0x1480   :  { %v3324_v11 = vpop.f32.mrb[19].mxu1 }
0x1482   :  { %v2111_v32 = vpop.f32.mrb[22].mxu0 }
0x1483   :  { %v2112_v7 = vadd.f32 %v2111_v32, %v2035_v6  ;;  %v3335_v8 = vpop.f32.mrb[23].mxu0  ;;  %v2419_v6 = vld [vmem:[#allocation7 + $0x10] sm:$0xff] }
0x1485   :  { %v2115_v35 = vadd.f32 %v4047_v46, %v2112_v7 }
0x1487   :  { %3672 = vtanh.f32 %v2115_v35  ;;  %v2206_v36 = vpop.f32.mrb[20].mxu1  ;;  %v2966_v15 = vmul.f32 -1.442695, %v2115_v35 }
0x1488   :  { %v2211_v9 = vrot.slane %v2206_v36, 2  ;;  %v3346_v10 = vpop.f32.mrb[21].mxu1 }
0x148a   :  { %v2213_v12 = vadd.f32 %v2211_v9, %v3990_v14  ;;  %v2422_v9 = vld [vmem:[%s4364_s9] sm:$0x1] }
0x148c   :  { %3674 = vtanh.f32 %v2213_v12  ;;  %v2968_v17 = vmul.f32 -1.442695, %v2213_v12 }
0x148d   :  { %3676 = vpow2.f32 %v2966_v15 }
0x148e   :  { %3678 = vpow2.f32 %v2968_v17 }
0x1491   :  { %v3673_v13 = vpop.eup %3672 }
0x1492   :  { %2125 = vrot.lane.b32.xlu1 %v3673_v13, %s3817_s11 }
0x1496   :  { %v3675_v39 = vpop.eup %3674 }
0x1497   :  { %2226 = vrot.lane.b32.xlu0 %v3675_v39, %s3815_s26  ;;  %v3677_v18 = vpop.eup %3676 }
0x1498   :  { %v2119_v19 = vadd.f32 1.0, %v3677_v18  ;;  %v3679_v20 = vpop.eup %3678 }
0x1499   :  { %v2217_v21 = vadd.f32 1.0, %v3679_v20 }
0x149a   :  { %3680 = vrcp.f32 %v2119_v19 }
0x149b   :  { %3682 = vrcp.f32 %v2217_v21 }
0x14a4   :  { %v3681_v22 = vpop.eup %3680 }
0x14a5   :  { %v3683_v24 = vpop.eup %3682  ;;  %v2123_v27 = vmul.f32 %v3681_v22, %v4251_v56 }
0x14a6   :  { %v2224_v31 = vmul.f32 %v3683_v24, %v2222_v30 }
0x1504   :  { %v2126_v23 = vpop.permute.xlu1 %2125 }
0x1505   :  { %v2128_v14 = vmul.f32 %v3681_v22, %v2126_v23 }
0x1507   :  { %2130 = vrot.lane.b32.xlu1 %v2128_v14, %s3818_s6 }
0x1509   :  { %v2227_v25 = vpop.permute.xlu0 %2226 }
0x150a   :  { %v2229_v26 = vmul.f32 %v3683_v24, %v2227_v25  ;;  %v2423_v25 = vld [vmem:[%s4365_s10] sm:$0xff] }
0x150c   :  { %2231 = vrot.lane.b32.xlu0 %v2229_v26, %s3816_s3  ;;  %v2424_v26 = vld [vmem:[%s4365_s10 + $0x8] sm:$0xff] }
0x1579   :  { %v2131_v28 = vpop.permute.xlu1 %2130 }
0x157a   :  { %v2133_v29 = vadd.f32 %v2131_v28, %v2123_v27  ;;  %v3540_v27 = vpack.c.bf16 %v2424_v26, %v2423_v25 }
0x157c   :  { %3684 = vtanh.f32 %v2133_v29 }
0x157e   :  { %v2232_v33 = vpop.permute.xlu0 %2231 }
0x157f   :  { %v2234_v16 = vadd.f32 %v2232_v33, %v2224_v31 }
0x1581   :  { %3686 = vtanh.f32 %v2234_v16 }
0x1586   :  { %v3685_v34 = vpop.eup %3684 }
0x1587   :  { %2136 = vrot.lane.b32.xlu1 %v3685_v34, %s3819_s7 }
0x158b   :  { %v3687_v37 = vpop.eup %3686 }
0x158c   :  { %2237 = vrot.lane.b32.xlu0 %v3687_v37, %s3815_s26 }
0x15f9   :  { %v2137_v38 = vpop.permute.xlu1 %2136 }
0x15fa   :  { %v2139_v40 = vmul.f32 %v3681_v22, %v2137_v38  ;;  %v2425_v38 = vld [vmem:[#allocation2] sm:$0x1] }
0x15fc   :  { %2242 = vrot.lane.b32.xlu0 %v2139_v40, %s3820_s21 }
0x15fe   :  { %v2238_v41 = vpop.permute.xlu0 %2237 }
0x15ff   :  { %v2240_v42 = vmul.f32 %v3683_v24, %v2238_v41 }
0x1601   :  { %v2317_v43 = vrot.slane %v2240_v42, 6 }
0x1603   :  { %2318 = vrot.lane.b32.xlu1 %v2317_v43, %s3816_s3 }
0x166e   :  { %v2243_v44 = vpop.permute.xlu0 %2242 }
0x166f   :  { %3354 = vmatmul.mubr.msk.f32.vlgmr.msra.gmra.mrb[24].mxu0 %vm303_vm4, %v2243_v44 }
0x1670   :  { %3371 = vmatprep.mubr.msk.f32.mxu0 %vm3813_vm0, %v3814_v2  ;;  %3535 = vmatpush3.bf16.msra.mxu0 %v4303_v5 }
0x1671   :  { %3539 = vmatprep.subr.bf16.mxu0 %v3812_v1 }
0x1673   :  { %3372 = vmatmul.mubr.f32.vlgmr.msra.gmra.mrb[26].mxu0 %v3814_v2 }
0x1674   :  { %3387 = vmatprep.mubr.msk.f32.mxu0 %vm3813_vm0, %v3814_v2  ;;  %3541 = vmatpush3.bf16.msra.mxu0 %v3540_v27 }
0x1675   :  { %v2319_v45 = vpop.permute.xlu1 %2318  ;;  %3542 = vmatprep.subr.bf16.mxu0 %v3812_v1 }
0x1676   :  { %3365 = vmatmul.mubr.msk.f32.vlgmr.msra.gmra.mrb[22].mxu1 %vm204_vm3, %v2319_v45 }
0x1677   :  { %3380 = vmatprep.mubr.msk.f32.mxu1 %vm3813_vm0, %v3814_v2 }
0x1742   :  { %v2312_v47 = vpop.f32.mrb[24].mxu0 }
0x1743   :  { %v3355_v48 = vpop.f32.mrb[25].mxu0 }
0x1746   :  { %v2495_v8 = vpop.f32.mrb[26].mxu0 }
0x1747   :  { %v3373_v35 = vpop.f32.mrb[27].mxu0 }
0x1749   :  { %v2388_v49 = vpop.f32.mrb[22].mxu1 }
0x174a   :  { %v2389_v50 = vadd.f32 %v2388_v49, %v2312_v47  ;;  %v3366_v51 = vpop.f32.mrb[23].mxu1 }
0x174c   :  { %v2392_v52 = vadd.f32 %v4047_v46, %v2389_v50  ;;  %v2418_v46 = vld [vmem:[#allocation7 + $0x8] sm:$0xff] }
0x174d   :  { %v3537_v3 = vpack.c.bf16 %v2418_v46, %v2417_v63 }
0x174e   :  { %3688 = vtanh.f32 %v2392_v52  ;;  %v2971_v54 = vmul.f32 -1.442695, %v2392_v52 }
0x174f   :  { %3538 = vmatpush3.bf16.msra.mxu1 %v3537_v3 }
0x1750   :  { %3690 = vpow2.f32 %v2971_v54  ;;  %3378 = vmatprep.subr.mxu1 %v3814_v2 }
0x1753   :  { %3379 = vmatpush3.msra.mxu1 %v2419_v6 }
0x1754   :  { %3545 = vmatprep.subr.bf16.mxu1 %v3812_v1 }
0x1758   :  { %v3689_v53 = vpop.eup %3688 }
0x1759   :  { %2402 = vrot.lane.b32.xlu0 %v3689_v53, %s3817_s11 }
0x175a   :  { %v3691_v55 = vpop.eup %3690 }
0x175b   :  { %v2396_v56 = vadd.f32 1.0, %v3691_v55 }
0x175d   :  { %3692 = vrcp.f32 %v2396_v56 }
0x1767   :  { %v3693_v57 = vpop.eup %3692 }
0x1768   :  { %v2400_v60 = vmul.f32 %v3693_v57, %v2133_v29 }
0x17cb   :  { %v2403_v58 = vpop.permute.xlu0 %2402 }
0x17cc   :  { %v2405_v59 = vmul.f32 %v3693_v57, %v2403_v58 }
0x17ce   :  { %2407 = vrot.lane.b32.xlu1 %v2405_v59, %s3818_s6 }
0x1840   :  { %v2408_v61 = vpop.permute.xlu1 %2407 }
0x1841   :  { %v2410_v62 = vadd.f32 %v2408_v61, %v2400_v60 }
0x1843   :  { %3694 = vtanh.f32 %v2410_v62 }
0x184d   :  { %v3695_v11 = vpop.eup %3694 }
0x184e   :  { %2413 = vrot.lane.b32.xlu0 %v3695_v11, %s3819_s7 }
0x18c0   :  { %v2414_v32 = vpop.permute.xlu0 %2413 }
0x18c1   :  { %v2416_v7 = vmul.f32 %v3693_v57, %v2414_v32 }
0x18c3   :  { %2500 = vrot.lane.b32.xlu1 %v2416_v7, %s3820_s21  ;;  %v2746_v29 = vrot.slane %v2416_v7, 1 }
0x1935   :  { %v2501_v36 = vpop.permute.xlu1 %2500 }
0x1936   :  { %3381 = vmatmul.mubr.msk.f32.vlgmr.msra.gmra.mrb[24].mxu1 %vm303_vm4, %v2501_v36 }
0x1937   :  { %3547 = vmatpush3.bf16.msra.mxu1 %v3537_v3  ;;  %3403 = vmatprep.mubr.msk.f32.mxu1 %vm3813_vm0, %v3814_v2 }
0x1938   :  { %3401 = vmatprep.subr.mxu1 %v3814_v2 }
0x193b   :  { %3402 = vmatpush3.msra.mxu1 %v2419_v6 }
0x1a09   :  { %v2570_v10 = vpop.f32.mrb[24].mxu1 }
0x1a0a   :  { %v2571_v12 = vadd.f32 %v2570_v10, %v2495_v8  ;;  %v3382_v13 = vpop.f32.mrb[25].mxu1 }
0x1a0c   :  { %v2574_v39 = vadd.f32 %v2571_v12, %v2422_v9 }
0x1a0e   :  { %3696 = vtanh.f32 %v2574_v39  ;;  %v2973_v17 = vmul.f32 -1.442695, %v2574_v39 }
0x1a10   :  { %3698 = vpow2.f32 %v2973_v17 }
0x1a18   :  { %v3697_v15 = vpop.eup %3696 }
0x1a19   :  { %2584 = vrot.lane.b32.xlu0 %v3697_v15, %s3821_s8 }
0x1a1a   :  { %v3699_v18 = vpop.eup %3698 }
0x1a1b   :  { %v2578_v19 = vadd.f32 1.0, %v3699_v18 }
0x1a1d   :  { %3700 = vrcp.f32 %v2578_v19 }
0x1a27   :  { %v3701_v20 = vpop.eup %3700 }
0x1a28   :  { %v2582_v23 = vmul.f32 0.0, %v3701_v20 }
0x1a8b   :  { %v2585_v21 = vpop.permute.xlu0 %2584 }
0x1a8c   :  { %v2587_v22 = vmul.f32 %v3701_v20, %v2585_v21 }
0x1a8e   :  { %2589 = vrot.lane.b32.xlu1 %v2587_v22, %s3822_s14 }
0x1b00   :  { %v2590_v14 = vpop.permute.xlu1 %2589 }
0x1b01   :  { %v2592_v24 = vadd.f32 %v2590_v14, %v2582_v23 }
0x1b03   :  { %3702 = vtanh.f32 %v2592_v24 }
0x1b0d   :  { %v3703_v28 = vpop.eup %3702 }
0x1b0e   :  { %2595 = vrot.lane.b32.xlu0 %v3703_v28, %s3816_s3 }
0x1b12   :  { %2747 = vrot.lane.b32.xlu0 %v2746_v29, %s3820_s21 }
0x1b80   :  { %v2596_v30 = vpop.permute.xlu0 %2595 }
0x1b81   :  { %v2598_v31 = vmul.f32 %v3701_v20, %v2596_v30 }
0x1b83   :  { %2600 = vrot.lane.b32.xlu1 %v2598_v31, %s3817_s11 }
0x1b84   :  { %v2748_v33 = vpop.permute.xlu0 %2747 }
0x1b85   :  { %3404 = vmatmul.mubr.msk.f32.vlgmr.msra.gmra.mrb[26].mxu1 %vm303_vm4, %v2748_v33 }
0x1bf5   :  { %v2601_v16 = vpop.permute.xlu1 %2600 }
0x1bf6   :  { %3388 = vmatmul.mubr.msk.f32.vlgmr.msra.gmra.mrb[28].mxu0 %vm2426_vm5, %v2601_v16 }
0x1bf7   :  { %3544 = vmatpush3.bf16.msra.mxu0 %v4303_v5  ;;  %3394 = vmatprep.mubr.msk.f32.mxu0 %vm3813_vm0, %v3814_v2 }
0x1bf8   :  { %3548 = vmatprep.subr.bf16.mxu0 %v3812_v1 }
0x1bfa   :  { %3395 = vmatmul.mubr.msk.f32.vlgmr.msra.gmra.mrb[30].mxu0 %vm2426_vm5, %v2601_v16 }
0x1bfb   :  { %3550 = vmatpush3.bf16.msra.mxu0 %v3540_v27  ;;  %3410 = vmatprep.mubr.msk.f32.mxu0 %vm3813_vm0, %v3814_v2 }
0x1c58   :  { %v2817_v34 = vpop.f32.mrb[26].mxu1 }
0x1c59   :  { %v3405_v37 = vpop.f32.mrb[27].mxu1 }
0x1cc9   :  { %v2670_v40 = vpop.f32.mrb[28].mxu0 }
0x1cca   :  { %v2671_v41 = vadd.f32 %v2670_v40, %v2425_v38  ;;  %v3389_v42 = vpop.f32.mrb[29].mxu0 }
0x1ccc   :  { %2675 = vst.msk [vmem:[%s4367_s12] sm:$0x1] %vm2674_vm6, %v2671_v41 }
0x1ccd   :  { %v2742_v43 = vpop.f32.mrb[30].mxu0 }
0x1cce   :  { %v2818_v1 = vadd.f32 %v2817_v34, %v2742_v43  ;;  %v3396_v44 = vpop.f32.mrb[31].mxu0 }
0x1cd0   :  { %v2821_v45 = vadd.f32 %v2818_v1, %v2422_v9 }
0x1cd2   :  { %3704 = vtanh.f32 %v2821_v45  ;;  %v2977_v2 = vmul.f32 -1.442695, %v2821_v45 }
0x1cd4   :  { %3706 = vpow2.f32 %v2977_v2 }
0x1cdc   :  { %v3705_v47 = vpop.eup %3704 }
0x1cdd   :  { %2831 = vrot.lane.b32.xlu1 %v3705_v47, %s3821_s8 }
0x1cde   :  { %v3707_v48 = vpop.eup %3706 }
0x1cdf   :  { %v2825_v49 = vadd.f32 1.0, %v3707_v48 }
0x1ce1   :  { %3708 = vrcp.f32 %v2825_v49 }
0x1ceb   :  { %v3709_v50 = vpop.eup %3708 }
0x1cec   :  { %v2829_v53 = vmul.f32 %v3709_v50, %v2592_v24 }
0x1d4f   :  { %v2832_v51 = vpop.permute.xlu1 %2831 }
0x1d50   :  { %v2834_v52 = vmul.f32 %v3709_v50, %v2832_v51 }
0x1d52   :  { %2836 = vrot.lane.b32.xlu0 %v2834_v52, %s3822_s14 }
0x1dc4   :  { %v2837_v54 = vpop.permute.xlu0 %2836 }
0x1dc5   :  { %v2839_v55 = vadd.f32 %v2837_v54, %v2829_v53 }
0x1dc7   :  { %3710 = vtanh.f32 %v2839_v55 }
0x1dd1   :  { %v3711_v56 = vpop.eup %3710 }
0x1dd2   :  { %2842 = vrot.lane.b32.xlu1 %v3711_v56, %s3816_s3 }
0x1e44   :  { %v2843_v57 = vpop.permute.xlu1 %2842 }
0x1e45   :  { %v2845_v58 = vmul.f32 %v3709_v50, %v2843_v57 }
0x1e47   :  { %2847 = vrot.lane.b32.xlu0 %v2845_v58, %s3817_s11 }
0x1eb9   :  { %v2848_v59 = vpop.permute.xlu0 %2847 }
0x1eba   :  { %3411 = vmatmul.mubr.msk.f32.vlgmr.msra.gmra.mrb[32].mxu0 %vm2426_vm5, %v2848_v59 }
0x1f8d   :  { %v2917_v60 = vpop.f32.mrb[32].mxu0 }
0x1f8e   :  { %v2918_v61 = vadd.f32 %v2917_v60, %v2425_v38  ;;  %v3412_v62 = vpop.f32.mrb[33].mxu0 }
0x1f90   :  { %2921 = vst.msk [vmem:[%s4367_s12 + $0x1] sm:$0x1] %vm2674_vm6, %v2918_v61 }
0x1f91   :  { %2926 = vsyncpa [#allocation4], 1 }
0x1f92   :  { %2927 = vsyncpa [#allocation6], 1 }
0x1f93   :  { %2928 = vsyncpa [#allocation9], 1 }

</bundles_post_ra>
